<compile_context>
chip_gen: v7x
topology: tpu7x:2x2x1
jax: 0.10.0
libtpu: 0.0.40
codegen_flags: <defaults>
</compile_context>

<pallas_src>
import functools

import jax
import jax.numpy as jnp
from jax.experimental import pallas as pl
from jax.experimental.pallas import tpu as pltpu


def _conv_bn_relu_kernel(x_ref, w_ref, b_ref, o_ref, *, KH, KW, TOH, OW, stride):
    """x_ref: (Hp, Wp, C) padded image (compute dtype)
       w_ref: (KH*KW, C, OCp) BN-scale-folded weights (compute dtype)
       b_ref: (1, OCp) f32 folded BN bias
       o_ref: (TOH*OW, OCp) f32 output tile (lane-dense, OCp % 128 == 0)."""
    t = pl.program_id(1)                       # output-row tile index
    row0 = t * (TOH * stride)                  # first padded input row of this tile
    C = x_ref.shape[-1]
    OCp = w_ref.shape[-1]
    TM = TOH * OW

    acc = jnp.zeros((TM, OCp), jnp.float32)
    for kh in range(KH):                       # static unrolled tap loop: KH*KW small matmuls
        for kw in range(KW):
            if stride > 1:
                h_idx = pl.ds(row0 + kh, TOH, stride)
                w_idx = pl.ds(kw, OW, stride)
            else:
                h_idx = pl.ds(row0 + kh, TOH)
                w_idx = pl.ds(kw, OW)
            patch = x_ref[h_idx, w_idx, :].reshape(TM, C)          # shifted window -> (TM, C)
            acc = acc + jnp.dot(patch, w_ref[kh * KW + kw],        # MXU, f32 accumulation
                                preferred_element_type=jnp.float32)
    y = acc + b_ref[...]                                           # folded BN bias (f32)
    o_ref[...] = jnp.maximum(y, 0.0).astype(o_ref.dtype)           # ReLU


def _pick_row_tile(OH, OW, N):
    """Output-row tile height: sublane-clean (TOH*OW % 8 == 0), <= ~1024 rows per M-tile
    (VMEM-friendly incl. v7x's 64 MiB), and >= 4 grid tiles when possible (2 TCs on v7x)."""
    divisors = [d for d in range(OH, 0, -1) if OH % d == 0 and (d * OW) % 8 == 0]
    if not divisors:
        return OH
    for d in divisors:
        if d * OW <= 1024 and N * (OH // d) >= 4:
            return d
    for d in divisors:
        if d * OW <= 1024:
            return d
    return divisors[-1]


def conv_block_forward(x_nchw, weight, gamma, beta, running_mean, running_var,
                       *, stride=1, padding=1, bn_eps=1e-5,
                       compute_dtype=jnp.bfloat16):
    """ConvBlock forward: Conv2d(bias=False) -> BatchNorm2d (running stats) -> ReLU."""
    # TODO(synk): dilation != 1 and groups != 1 are not implemented.
    # TODO(synk): training-mode BatchNorm (batch statistics) not modeled; eval semantics used.
    N, C, H, W = x_nchw.shape
    OC, wc, KH, KW = weight.shape
    assert wc == C, "groups != 1 not supported"
    OH = (H + 2 * padding - KH) // stride + 1
    OW = (W + 2 * padding - KW) // stride + 1
    Hp, Wp = H + 2 * padding, W + 2 * padding

    # Padded NHWC input in the MXU compute dtype (no 9x im2col copy in HBM).
    x = jnp.transpose(x_nchw, (0, 2, 3, 1))
    xp = jnp.pad(x, ((0, 0), (padding, padding), (padding, padding), (0, 0)))
    xp = xp.astype(compute_dtype)

    # Fold BN scale into the weights; keep the per-channel bias as an f32 add in the epilogue.
    scale = (gamma / jnp.sqrt(running_var + bn_eps)).astype(jnp.float32)
    bias = (beta - running_mean * scale).astype(jnp.float32)
    w = jnp.transpose(weight.astype(jnp.float32), (2, 3, 1, 0))          # (KH, KW, C, OC)
    w = (w * scale[None, None, None, :]).reshape(KH * KW, C, OC)

    # Pad OC to a multiple of 128 -> lane-dense output block, unmasked vector stores.
    OCp = ((OC + 127) // 128) * 128
    w_p = jnp.pad(w, ((0, 0), (0, 0), (0, OCp - OC))).astype(compute_dtype)
    bias_p = jnp.pad(bias, (0, OCp - OC)).reshape(1, OCp).astype(jnp.float32)

    TOH = _pick_row_tile(OH, OW, N)
    n_h_tiles = OH // TOH
    TM = TOH * OW
    M = N * OH * OW

    kernel = functools.partial(_conv_bn_relu_kernel,
                               KH=KH, KW=KW, TOH=TOH, OW=OW, stride=stride)

    out = pl.pallas_call(
        kernel,
        out_shape=jax.ShapeDtypeStruct((M, OCp), jnp.float32),
        grid=(N, n_h_tiles),
        in_specs=[
            # Full padded image of batch n (batch dim squeezed); same block for all row tiles.
            pl.BlockSpec((None, Hp, Wp, C), lambda n, t: (n, 0, 0, 0)),
            # Folded weights and bias: whole (small) arrays, resident across the grid.
            pl.BlockSpec((KH * KW, C, OCp), lambda n, t: (0, 0, 0)),
            pl.BlockSpec((1, OCp), lambda n, t: (0, 0)),
        ],
        out_specs=pl.BlockSpec((TM, OCp), lambda n, t: (n * n_h_tiles + t, 0)),
        compiler_params=pltpu.CompilerParams(
            dimension_semantics=("parallel", "parallel"),
            vmem_limit_bytes=32 * 1024 * 1024),
        cost_estimate=pl.CostEstimate(
            flops=2 * M * KH * KW * C * OCp,
            transcendentals=0,
            bytes_accessed=(xp.size * xp.dtype.itemsize
                            + w_p.size * w_p.dtype.itemsize
                            + bias_p.size * bias_p.dtype.itemsize
                            + M * OCp * 4)),
    )(xp, w_p, bias_p)

    out = out.reshape(N, OH, OW, OCp)[..., :OC]          # drop OC padding
    return jnp.transpose(out, (0, 3, 1, 2))              # back to NCHW


def _reference(x, weight, gamma, beta, mean, var, *, stride, padding, bn_eps, compute_dtype):
    """Pure-JAX reference with the same BN folding + operand quantization as the kernel."""
    scale = gamma / jnp.sqrt(var + bn_eps)
    w_folded = weight.astype(jnp.float32) * scale[:, None, None, None]
    w_q = w_folded.astype(compute_dtype).astype(jnp.float32)
    x_q = x.astype(compute_dtype).astype(jnp.float32)
    y = jax.lax.conv_general_dilated(
        x_q, w_q, (stride, stride),
        [(padding, padding), (padding, padding)],
        dimension_numbers=("NCHW", "OIHW", "NCHW"))
    b = (beta - mean * scale).reshape(1, -1, 1, 1)
    return jnp.maximum(y + b, 0.0)


if __name__ == "__main__":
    # ConvBlock(in_channels=4, out_channels=8, kernel_size=3, stride=1, padding=1)
    N, C, H, W = 2, 4, 16, 16
    OC, KH, KW = 8, 3, 3
    stride, padding, bn_eps = 1, 1, 1e-5

    key = jax.random.PRNGKey(0)
    kx, kw_, kg, kb, km, kv = jax.random.split(key, 6)
    x = jax.random.normal(kx, (N, C, H, W), dtype=jnp.float32)
    weight = jax.random.normal(kw_, (OC, C, KH, KW), dtype=jnp.float32) * 0.1
    gamma = 1.0 + 0.1 * jax.random.normal(kg, (OC,), dtype=jnp.float32)
    beta = 0.1 * jax.random.normal(kb, (OC,), dtype=jnp.float32)
    running_mean = 0.1 * jax.random.normal(km, (OC,), dtype=jnp.float32)
    running_var = 1.0 + 0.1 * jax.random.uniform(kv, (OC,), dtype=jnp.float32)

    out = conv_block_forward(x, weight, gamma, beta, running_mean, running_var,
                             stride=stride, padding=padding, bn_eps=bn_eps)
    out = jax.block_until_ready(out)
    assert out.shape == (N, OC, H, W)

    # Tight check vs a reference using identical bf16 operand quantization + f32 accumulation.
    ref_bf16 = _reference(x, weight, gamma, beta, running_mean, running_var,
                          stride=stride, padding=padding, bn_eps=bn_eps,
                          compute_dtype=jnp.bfloat16)
    assert jnp.allclose(out, ref_bf16, atol=1e-4, rtol=1e-4), "mismatch vs bf16-matched reference"

    # Sanity check vs the full-f32 eval-mode ConvBlock (bf16 operand quantization error only).
    ref_f32 = _reference(x, weight, gamma, beta, running_mean, running_var,
                         stride=stride, padding=padding, bn_eps=bn_eps,
                         compute_dtype=jnp.float32)
    assert jnp.allclose(out, ref_f32, atol=5e-2, rtol=5e-2), "mismatch vs f32 reference"

    print("KERNEL_OK")
</pallas_src>

<mosaic_0001>
module attributes {stable_mosaic.version = 11 : i64} {
  func.func @_conv_bn_relu_kernel(%arg0: i32, %arg1: i32, %arg2: memref<1x18x18x4xbf16, #tpu.memory_space<vmem>>, %arg3: memref<9x4x128xbf16, #tpu.memory_space<vmem>>, %arg4: memref<1x128xf32, #tpu.memory_space<vmem>>, %arg5: memref<128x128xf32, #tpu.memory_space<vmem>>) attributes {dimension_semantics = [#tpu.dimension_semantics<parallel>, #tpu.dimension_semantics<parallel>], iteration_bounds = array<i64: 2, 2>, scalar_prefetch = 0 : i64, scratch_operands = 0 : i64, tpu.core_type = #tpu.core_type<tc>, window_params = [{transform_indices = @transform_0, window_bounds = array<i64: 1, 18, 18, 4>}, {pipeline_mode = #tpu.pipeline_mode<synchronous>, transform_indices = @transform_1, window_bounds = array<i64: 9, 4, 128>}, {pipeline_mode = #tpu.pipeline_mode<synchronous>, transform_indices = @transform_2, window_bounds = array<i64: 1, 128>}, {transform_indices = @transform_3, window_bounds = array<i64: 128, 128>}]} {
    %c8_i32 = arith.constant 8 : i32
    %0 = arith.muli %arg1, %c8_i32 : i32
    %cst = arith.constant 0.000000e+00 : f32
    %1 = vector.broadcast %cst : f32 to vector<128x128xf32>
    %c0_i32 = arith.constant 0 : i32
    %2 = arith.addi %0, %c0_i32 : i32
    %c0 = arith.constant 0 : index
    %3 = arith.index_cast %2 : i32 to index
    %c0_0 = arith.constant 0 : index
    %c0_1 = arith.constant 0 : index
    %4 = vector.load %arg2[%c0, %3, %c0_0, %c0_1] : memref<1x18x18x4xbf16, #tpu.memory_space<vmem>>, vector<1x8x16x4xbf16>
    %5 = vector.shape_cast %4 : vector<1x8x16x4xbf16> to vector<8x16x4xbf16>
    %6 = vector.shape_cast %5 : vector<8x16x4xbf16> to vector<128x4xbf16>
    %c0_2 = arith.constant 0 : index
    %c0_3 = arith.constant 0 : index
    %c0_4 = arith.constant 0 : index
    %7 = vector.load %arg3[%c0_2, %c0_3, %c0_4] : memref<9x4x128xbf16, #tpu.memory_space<vmem>>, vector<1x4x128xbf16>
    %8 = vector.shape_cast %7 : vector<1x4x128xbf16> to vector<4x128xbf16>
    %cst_5 = arith.constant dense<0.000000e+00> : vector<128x128xf32>
    %9 = tpu.matmul %6, %8, %cst_5 {dimension_numbers = #tpu.dot_dimension_numbers<[1], [0], [0], [1], [0, 0, 1, 1], [], []>} : vector<128x4xbf16>, vector<4x128xbf16>, vector<128x128xf32> -> vector<128x128xf32>
    %10 = arith.addf %1, %9 : vector<128x128xf32>
    %c0_i32_6 = arith.constant 0 : i32
    %11 = arith.addi %0, %c0_i32_6 : i32
    %c0_7 = arith.constant 0 : index
    %12 = arith.index_cast %11 : i32 to index
    %c1 = arith.constant 1 : index
    %c0_8 = arith.constant 0 : index
    %13 = vector.load %arg2[%c0_7, %12, %c1, %c0_8] : memref<1x18x18x4xbf16, #tpu.memory_space<vmem>>, vector<1x8x16x4xbf16>
    %14 = vector.shape_cast %13 : vector<1x8x16x4xbf16> to vector<8x16x4xbf16>
    %15 = vector.shape_cast %14 : vector<8x16x4xbf16> to vector<128x4xbf16>
    %c1_9 = arith.constant 1 : index
    %c0_10 = arith.constant 0 : index
    %c0_11 = arith.constant 0 : index
    %16 = vector.load %arg3[%c1_9, %c0_10, %c0_11] : memref<9x4x128xbf16, #tpu.memory_space<vmem>>, vector<1x4x128xbf16>
    %17 = vector.shape_cast %16 : vector<1x4x128xbf16> to vector<4x128xbf16>
    %cst_12 = arith.constant dense<0.000000e+00> : vector<128x128xf32>
    %18 = tpu.matmul %15, %17, %cst_12 {dimension_numbers = #tpu.dot_dimension_numbers<[1], [0], [0], [1], [0, 0, 1, 1], [], []>} : vector<128x4xbf16>, vector<4x128xbf16>, vector<128x128xf32> -> vector<128x128xf32>
    %19 = arith.addf %10, %18 : vector<128x128xf32>
    %c0_i32_13 = arith.constant 0 : i32
    %20 = arith.addi %0, %c0_i32_13 : i32
    %c0_14 = arith.constant 0 : index
    %21 = arith.index_cast %20 : i32 to index
    %c2 = arith.constant 2 : index
    %c0_15 = arith.constant 0 : index
    %22 = vector.load %arg2[%c0_14, %21, %c2, %c0_15] : memref<1x18x18x4xbf16, #tpu.memory_space<vmem>>, vector<1x8x16x4xbf16>
    %23 = vector.shape_cast %22 : vector<1x8x16x4xbf16> to vector<8x16x4xbf16>
    %24 = vector.shape_cast %23 : vector<8x16x4xbf16> to vector<128x4xbf16>
    %c2_16 = arith.constant 2 : index
    %c0_17 = arith.constant 0 : index
    %c0_18 = arith.constant 0 : index
    %25 = vector.load %arg3[%c2_16, %c0_17, %c0_18] : memref<9x4x128xbf16, #tpu.memory_space<vmem>>, vector<1x4x128xbf16>
    %26 = vector.shape_cast %25 : vector<1x4x128xbf16> to vector<4x128xbf16>
    %cst_19 = arith.constant dense<0.000000e+00> : vector<128x128xf32>
    %27 = tpu.matmul %24, %26, %cst_19 {dimension_numbers = #tpu.dot_dimension_numbers<[1], [0], [0], [1], [0, 0, 1, 1], [], []>} : vector<128x4xbf16>, vector<4x128xbf16>, vector<128x128xf32> -> vector<128x128xf32>
    %28 = arith.addf %19, %27 : vector<128x128xf32>
    %c1_i32 = arith.constant 1 : i32
    %29 = arith.addi %0, %c1_i32 : i32
    %c0_20 = arith.constant 0 : index
    %30 = arith.index_cast %29 : i32 to index
    %c0_21 = arith.constant 0 : index
    %c0_22 = arith.constant 0 : index
    %31 = vector.load %arg2[%c0_20, %30, %c0_21, %c0_22] : memref<1x18x18x4xbf16, #tpu.memory_space<vmem>>, vector<1x8x16x4xbf16>
    %32 = vector.shape_cast %31 : vector<1x8x16x4xbf16> to vector<8x16x4xbf16>
    %33 = vector.shape_cast %32 : vector<8x16x4xbf16> to vector<128x4xbf16>
    %c3 = arith.constant 3 : index
    %c0_23 = arith.constant 0 : index
    %c0_24 = arith.constant 0 : index
    %34 = vector.load %arg3[%c3, %c0_23, %c0_24] : memref<9x4x128xbf16, #tpu.memory_space<vmem>>, vector<1x4x128xbf16>
    %35 = vector.shape_cast %34 : vector<1x4x128xbf16> to vector<4x128xbf16>
    %cst_25 = arith.constant dense<0.000000e+00> : vector<128x128xf32>
    %36 = tpu.matmul %33, %35, %cst_25 {dimension_numbers = #tpu.dot_dimension_numbers<[1], [0], [0], [1], [0, 0, 1, 1], [], []>} : vector<128x4xbf16>, vector<4x128xbf16>, vector<128x128xf32> -> vector<128x128xf32>
    %37 = arith.addf %28, %36 : vector<128x128xf32>
    %c1_i32_26 = arith.constant 1 : i32
    %38 = arith.addi %0, %c1_i32_26 : i32
    %c0_27 = arith.constant 0 : index
    %39 = arith.index_cast %38 : i32 to index
    %c1_28 = arith.constant 1 : index
    %c0_29 = arith.constant 0 : index
    %40 = vector.load %arg2[%c0_27, %39, %c1_28, %c0_29] : memref<1x18x18x4xbf16, #tpu.memory_space<vmem>>, vector<1x8x16x4xbf16>
    %41 = vector.shape_cast %40 : vector<1x8x16x4xbf16> to vector<8x16x4xbf16>
    %42 = vector.shape_cast %41 : vector<8x16x4xbf16> to vector<128x4xbf16>
    %c4 = arith.constant 4 : index
    %c0_30 = arith.constant 0 : index
    %c0_31 = arith.constant 0 : index
    %43 = vector.load %arg3[%c4, %c0_30, %c0_31] : memref<9x4x128xbf16, #tpu.memory_space<vmem>>, vector<1x4x128xbf16>
    %44 = vector.shape_cast %43 : vector<1x4x128xbf16> to vector<4x128xbf16>
    %cst_32 = arith.constant dense<0.000000e+00> : vector<128x128xf32>
    %45 = tpu.matmul %42, %44, %cst_32 {dimension_numbers = #tpu.dot_dimension_numbers<[1], [0], [0], [1], [0, 0, 1, 1], [], []>} : vector<128x4xbf16>, vector<4x128xbf16>, vector<128x128xf32> -> vector<128x128xf32>
    %46 = arith.addf %37, %45 : vector<128x128xf32>
    %c1_i32_33 = arith.constant 1 : i32
    %47 = arith.addi %0, %c1_i32_33 : i32
    %c0_34 = arith.constant 0 : index
    %48 = arith.index_cast %47 : i32 to index
    %c2_35 = arith.constant 2 : index
    %c0_36 = arith.constant 0 : index
    %49 = vector.load %arg2[%c0_34, %48, %c2_35, %c0_36] : memref<1x18x18x4xbf16, #tpu.memory_space<vmem>>, vector<1x8x16x4xbf16>
    %50 = vector.shape_cast %49 : vector<1x8x16x4xbf16> to vector<8x16x4xbf16>
    %51 = vector.shape_cast %50 : vector<8x16x4xbf16> to vector<128x4xbf16>
    %c5 = arith.constant 5 : index
    %c0_37 = arith.constant 0 : index
    %c0_38 = arith.constant 0 : index
    %52 = vector.load %arg3[%c5, %c0_37, %c0_38] : memref<9x4x128xbf16, #tpu.memory_space<vmem>>, vector<1x4x128xbf16>
    %53 = vector.shape_cast %52 : vector<1x4x128xbf16> to vector<4x128xbf16>
    %cst_39 = arith.constant dense<0.000000e+00> : vector<128x128xf32>
    %54 = tpu.matmul %51, %53, %cst_39 {dimension_numbers = #tpu.dot_dimension_numbers<[1], [0], [0], [1], [0, 0, 1, 1], [], []>} : vector<128x4xbf16>, vector<4x128xbf16>, vector<128x128xf32> -> vector<128x128xf32>
    %55 = arith.addf %46, %54 : vector<128x128xf32>
    %c2_i32 = arith.constant 2 : i32
    %56 = arith.addi %0, %c2_i32 : i32
    %c0_40 = arith.constant 0 : index
    %57 = arith.index_cast %56 : i32 to index
    %c0_41 = arith.constant 0 : index
    %c0_42 = arith.constant 0 : index
    %58 = vector.load %arg2[%c0_40, %57, %c0_41, %c0_42] : memref<1x18x18x4xbf16, #tpu.memory_space<vmem>>, vector<1x8x16x4xbf16>
    %59 = vector.shape_cast %58 : vector<1x8x16x4xbf16> to vector<8x16x4xbf16>
    %60 = vector.shape_cast %59 : vector<8x16x4xbf16> to vector<128x4xbf16>
    %c6 = arith.constant 6 : index
    %c0_43 = arith.constant 0 : index
    %c0_44 = arith.constant 0 : index
    %61 = vector.load %arg3[%c6, %c0_43, %c0_44] : memref<9x4x128xbf16, #tpu.memory_space<vmem>>, vector<1x4x128xbf16>
    %62 = vector.shape_cast %61 : vector<1x4x128xbf16> to vector<4x128xbf16>
    %cst_45 = arith.constant dense<0.000000e+00> : vector<128x128xf32>
    %63 = tpu.matmul %60, %62, %cst_45 {dimension_numbers = #tpu.dot_dimension_numbers<[1], [0], [0], [1], [0, 0, 1, 1], [], []>} : vector<128x4xbf16>, vector<4x128xbf16>, vector<128x128xf32> -> vector<128x128xf32>
    %64 = arith.addf %55, %63 : vector<128x128xf32>
    %c2_i32_46 = arith.constant 2 : i32
    %65 = arith.addi %0, %c2_i32_46 : i32
    %c0_47 = arith.constant 0 : index
    %66 = arith.index_cast %65 : i32 to index
    %c1_48 = arith.constant 1 : index
    %c0_49 = arith.constant 0 : index
    %67 = vector.load %arg2[%c0_47, %66, %c1_48, %c0_49] : memref<1x18x18x4xbf16, #tpu.memory_space<vmem>>, vector<1x8x16x4xbf16>
    %68 = vector.shape_cast %67 : vector<1x8x16x4xbf16> to vector<8x16x4xbf16>
    %69 = vector.shape_cast %68 : vector<8x16x4xbf16> to vector<128x4xbf16>
    %c7 = arith.constant 7 : index
    %c0_50 = arith.constant 0 : index
    %c0_51 = arith.constant 0 : index
    %70 = vector.load %arg3[%c7, %c0_50, %c0_51] : memref<9x4x128xbf16, #tpu.memory_space<vmem>>, vector<1x4x128xbf16>
    %71 = vector.shape_cast %70 : vector<1x4x128xbf16> to vector<4x128xbf16>
    %cst_52 = arith.constant dense<0.000000e+00> : vector<128x128xf32>
    %72 = tpu.matmul %69, %71, %cst_52 {dimension_numbers = #tpu.dot_dimension_numbers<[1], [0], [0], [1], [0, 0, 1, 1], [], []>} : vector<128x4xbf16>, vector<4x128xbf16>, vector<128x128xf32> -> vector<128x128xf32>
    %73 = arith.addf %64, %72 : vector<128x128xf32>
    %c2_i32_53 = arith.constant 2 : i32
    %74 = arith.addi %0, %c2_i32_53 : i32
    %c0_54 = arith.constant 0 : index
    %75 = arith.index_cast %74 : i32 to index
    %c2_55 = arith.constant 2 : index
    %c0_56 = arith.constant 0 : index
    %76 = vector.load %arg2[%c0_54, %75, %c2_55, %c0_56] : memref<1x18x18x4xbf16, #tpu.memory_space<vmem>>, vector<1x8x16x4xbf16>
    %77 = vector.shape_cast %76 : vector<1x8x16x4xbf16> to vector<8x16x4xbf16>
    %78 = vector.shape_cast %77 : vector<8x16x4xbf16> to vector<128x4xbf16>
    %c8 = arith.constant 8 : index
    %c0_57 = arith.constant 0 : index
    %c0_58 = arith.constant 0 : index
    %79 = vector.load %arg3[%c8, %c0_57, %c0_58] : memref<9x4x128xbf16, #tpu.memory_space<vmem>>, vector<1x4x128xbf16>
    %80 = vector.shape_cast %79 : vector<1x4x128xbf16> to vector<4x128xbf16>
    %cst_59 = arith.constant dense<0.000000e+00> : vector<128x128xf32>
    %81 = tpu.matmul %78, %80, %cst_59 {dimension_numbers = #tpu.dot_dimension_numbers<[1], [0], [0], [1], [0, 0, 1, 1], [], []>} : vector<128x4xbf16>, vector<4x128xbf16>, vector<128x128xf32> -> vector<128x128xf32>
    %82 = arith.addf %73, %81 : vector<128x128xf32>
    %c0_60 = arith.constant 0 : index
    %c0_61 = arith.constant 0 : index
    %83 = vector.load %arg4[%c0_60, %c0_61] : memref<1x128xf32, #tpu.memory_space<vmem>>, vector<1x128xf32>
    %84 = vector.broadcast %83 : vector<1x128xf32> to vector<128x128xf32>
    %85 = arith.addf %82, %84 : vector<128x128xf32>
    %cst_62 = arith.constant 0.000000e+00 : f32
    %86 = vector.broadcast %cst_62 : f32 to vector<128x128xf32>
    %87 = arith.maximumf %85, %86 : vector<128x128xf32>
    %c0_63 = arith.constant 0 : index
    %c0_64 = arith.constant 0 : index
    %88 = vector.load %arg5[%c0_63, %c0_64] : memref<128x128xf32, #tpu.memory_space<vmem>>, vector<128x128xf32>
    tpu.vector_store %arg5[%c0_63, %c0_64], %87 {strides = array<i32>} : memref<128x128xf32, #tpu.memory_space<vmem>>, vector<128x128xf32>,
    return
  }
  func.func @transform_0(%arg0: i32, %arg1: i32) -> (i32, i32, i32, i32) {
    %c0_i32 = arith.constant 0 : i32
    %c0_i32_0 = arith.constant 0 : i32
    %c0_i32_1 = arith.constant 0 : i32
    %c0_i32_2 = arith.constant 0 : i32
    return %arg0, %c0_i32, %c0_i32_0, %c0_i32_1 : i32, i32, i32, i32
  }
  func.func @transform_1(%arg0: i32, %arg1: i32) -> (i32, i32, i32) {
    %c0_i32 = arith.constant 0 : i32
    %c0_i32_0 = arith.constant 0 : i32
    %c0_i32_1 = arith.constant 0 : i32
    %c0_i32_2 = arith.constant 0 : i32
    return %c0_i32, %c0_i32_0, %c0_i32_1 : i32, i32, i32
  }
  func.func @transform_2(%arg0: i32, %arg1: i32) -> (i32, i32) {
    %c0_i32 = arith.constant 0 : i32
    %c0_i32_0 = arith.constant 0 : i32
    %c0_i32_1 = arith.constant 0 : i32
    return %c0_i32, %c0_i32_0 : i32, i32
  }
  func.func @transform_3(%arg0: i32, %arg1: i32) -> (i32, i32) {
    %c2_i32 = arith.constant 2 : i32
    %0 = arith.muli %arg0, %c2_i32 : i32
    %1 = arith.addi %0, %arg1 : i32
    %c0_i32 = arith.constant 0 : i32
    %c0_i32_0 = arith.constant 0 : i32
    return %1, %c0_i32 : i32, i32
  }
}

</mosaic_0001>

<bundles_post_ra>
// kernel: tpu_custom_call.1
= control target key start
LH: loop header
LB: loop body
LE: loop exit
PB: predicated region body
PF: predicated region fallthrough
CT: control target
= control target key end

     0   :  { %8 = vsyncpa [#allocation3], 0  ;;  %s4748_s0 = inlined_call_operand.vmem [shape: bf16[2,18,18,4], index: 0, kind: input, shape index: {}]   ;;  %s4749_s1 = inlined_call_operand.vmem [shape: bf16[9,4,128], index: 1, kind: input, shape index: {}]   ;;  %s4750_s2 = inlined_call_operand.vmem [shape: f32[1,128], index: 2, kind: input, shape index: {}]   ;;  %s4751_s3 = inlined_call_operand.hbm [shape: f32[512,128], index: 3, kind: output, shape index: {}]  }
   0x1   :  { %10 = vsyncpa [#allocation3 + $0x1], 0  ;;  %s3708_s12 = smov 0   ;;  %s3710_s13 = smov 0  }
   0x2   :  { %s3712_s14 = smov 0   ;;  %s3714_s15 = smov 0  }
   0x3   :  { %s3716_s16 = smov 0   ;;  %s3718_s17 = smov 0  }
   0x4   :  { %s3720_s18 = smov 0   ;;  %s3722_s19 = smov 0  }
   0x5 LB: > { %s2810_s20 = sadd.s32 4294967295, %s3683_s19   ;;  %s25_s21 = sadd.s32 1, %s3675_s17  ;;  %s3683_s19 = sphi %s3722_s19, %s16_s19   ;;  %s3679_s18 = sphi %s3720_s18, %s4782_s18   ;;  %s3675_s17 = sphi %s3718_s17, %s4781_s17   ;;  %s3671_s16 = sphi %s3716_s16, %s4780_s16   ;;  %s3667_s15 = sphi %s3714_s15, %s4779_s15   ;;  %s3663_s14 = sphi %s3712_s14, %s4778_s14   ;;  %s3659_s13 = sphi %s3710_s13, %s4777_s13   ;;  %s3655_s12 = sphi %s3708_s12, %s4776_s12  }
   0x6   : > { %s28_s22 = sadd.s32 1, %s3679_s18  ;;  %p26_p0 = scmp.ge.s32.totalorder %s25_s21, 2 }
   0x7   : > { %s2812_s23 = sshll.u32 %s3679_s18, 1  ;;  %s2811_s24 = sadd.s32 4294967294, %s3683_s19  }
   0x8   : > { %s101_s25 = sadd.s32 %s3675_s17, %s2812_s23  ;;  %s4784_s21 = smov (%p26_p0, %s25_s21), 0 }
   0x9   : > { %s4786_s22 = smov (!%p26_p0, %s28_s22), %s3679_s18  ;;  %p117_p1 = scmp.ne.s32.totalorder %s3663_s14, %s3659_s13 }
   0xa   : > { %p118_p2 = scmp.eq.s32.totalorder %s2810_s20, 3  ;;  %p30_p3 = scmp.ge.s32.totalorder %s4786_s22, 2 }
   0xb   : > { %p123_p4 = scmp.ne.s32.totalorder %s3659_s13, %s3655_s12  ;;  %p124_p6 = scmp.eq.s32.totalorder %s2811_s24, 3 }
   0xc   : > { %p3761_p5 = por %p118_p2, %p117_p1  ;;  %s4788_s22 = smov (%p30_p3, %s4786_s22), 0 }
   0xd   : > { %p3767_p7 = por %p124_p6, %p123_p4  ;;  %p2816_p8 = scmp.ge.s32.totalorder %s3683_s19, 1 }
   0xe   : > { %s2813_s28 = sshll.u32 %s4788_s22, 1  ;;  %p156_p9 = scmp.lt.s32.totalorder %s3683_s19, 5 }
   0xf   : > { %s103_s29 = sadd.s32 %s2813_s28, %s4784_s21  ;;  %s107_s30 = sadd.s32 1, %s3663_s14 }
  0x10   : > { %s104_s4 = ssub.s32 %s101_s25, %s103_s29  ;;  %p157_p10 = pnand %p2816_p8, %p156_p9 }
  0x11   : > { %p105_p11 = scmp.eq.s32.totalorder %s104_s4, 0 }
  0x12   : > { %160 = sbr.rel (%p157_p10) target bundleno = 445 (0x1bd), region = 32 }
  0x13   : > { %s3777_s5 = scalar_select %p105_p11, %s3663_s14, %s107_s30  }
  0x19   : > { %v2822_v0 = vld [vmem:[%s4749_s1 + $0x2] sm:$0x3]  ;;  %vm464_vm0 = vcmask 1041408   ;;  %v2939_v1 = vld [vmem:[%s4749_s1 + $0x8] sm:$0x3]  ;;  %p180_p12 = scmp.lt.s32.totalorder %s3671_s16, 1 }
  0x1a   : > { %3480 = vmatprep.subr.msk.bf16.mxu1 %vm464_vm0, %v2822_v0  ;;  %3484 = vmatprep.subr.msk.bf16.mxu0 %vm464_vm0, %v2939_v1  ;;  %v466_v2 = vsel %vm464_vm0, %v2822_v0, 0  ;;  %v3790_v3 = vsel %vm464_vm0, %v2939_v1, 0  ;;  %v209_v4 = vld [vmem:[%s4749_s1] sm:$0x3]  ;;  %s3105_s23 = smul.u32 96, %s3667_s15  ;;  %vm439_vm3 = vcmask 31744  }
  0x1b   : > { %3189 = vmatpush3.bf16.msra.mxu1 %v466_v2  ;;  %3261 = vmatpush3.bf16.msra.mxu0 %v3790_v3  ;;  %s181_s10 = scalar_select %p180_p12, %s3671_s16, 1  ;;  %v2972_v5 = vld [vmem:[%s4749_s1 + $0xa] sm:$0x3]  ;;  %vm218_vm1 = vsmask.f32 3328  ;;  %v3830_v17 = vsel %vm464_vm0, %v209_v4, 0 }
  0x1c   : > { %3481 = vmatprep.subr.msk.bf16.mxu1 %vm464_vm0, %v209_v4  ;;  %3486 = vmatprep.subr.msk.bf16.mxu0 %vm464_vm0, %v2972_v5  ;;  %vm219_vm2 = vsmask.f32 7440  ;;  %v3836_v26 = vld [vmem:[%s4749_s1 + $0xc] sm:$0x3]  ;;  %v3853_v37 = vsel %vm464_vm0, %v2972_v5, 0  ;;  %vm753_vm5 = vcmask 1042432  }
  0x1d   : > { %s3490_s28 = smul.u32 216, %s181_s10  ;;  %vm3845_vm4 = vmor %vm218_vm1, %vm219_vm2  ;;  %v3857_v41 = vsel %vm464_vm0, %v3836_v26, 0  ;;  %vm754_vm6 = vcmask 1046532   ;;  %v4646_v32 = vld [vmem:[%s4750_s2] ss:$0 sm:$0xff]  ;;  %s3100_s10 = sshll.u32 %s3671_s16, 1 }
  0x1e   : > { %vm4000_vm7 = vmor %vm753_vm5, %vm754_vm6  ;;  %s2718_s11 = sadd.s32 %s3667_s15, %s3100_s10  ;;  %s3685_s29 = smov [#allocation2]  }
  0x1f   : > { %s184_s4 = scalar_lea.vmem %s4748_s0, %s3490_s28  ;;  %s3106_s16 = sshll.u32 %s2718_s11, 11 }
  0x20   : > { %s3806_s6 = scalar_lea.vmem %s184_s4, %s3105_s23  ;;  %s177_s4 = sand.u32 1, %s3659_s13  }
  0x21   : > { %v3809_v6 = vld [vmem:[%s3806_s6] sm:$0xf]  ;;  %v3812_v7 = vld [vmem:[%s3806_s6 + $0x4] sm:$0xf]  ;;  %v3815_v8 = vld [vmem:[%s3806_s6 + $0x8] sm:$0x1]  ;;  %s4687_s24 = scalar_lea.hbm %s4751_s3, %s3106_s16 }
  0x22   : > { %v222_v9 = vshrl.u32 %v3809_v6, 16  ;;  %v225_v10 = vshll.u32 %v3809_v6, 16  ;;  %v231_v11 = vshll.u32 %v3812_v7, 16  ;;  %v235_v12 = vshrl.u32 %v3812_v7, 16  ;;  %v2915_v13 = vld [vmem:[%s3806_s6 + $0xc] sm:$0xf] }
  0x23   : > { %v241_v14 = vshll.u32 %v3815_v8, 16  ;;  %v3824_v15 = vld [vmem:[%s3806_s6 + $0x10] sm:$0xf]  ;;  %v3827_v16 = vld [vmem:[%s3806_s6 + $0x14] sm:$0x1]  ;;  %v1205_v23 = vshrl.u32 %v2915_v13, 16 }
  0x24   : > { %v224_v18 = vrot.slane %v222_v9, 4  ;;  %v227_v19 = vrot.slane %v225_v10, 5  ;;  %v233_v20 = vrot.slane %v231_v11, 5  ;;  %v237_v21 = vrot.slane %v235_v12, 4  ;;  %v3841_v31 = vld [vmem:[%s3806_s6 + $0xc] sm:$0xf] }
  0x25   : > { %v243_v22 = vrot.slane %v241_v14, 5  ;;  %v1208_v24 = vshll.u32 %v2915_v13, 16  ;;  %v1214_v25 = vshll.u32 %v3824_v15, 16  ;;  %v1218_v29 = vshrl.u32 %v3824_v15, 16  ;;  %v3850_v36 = vld [vmem:[%s3806_s6 + $0x10] sm:$0xf] }
  0x26   : > { %v228_v27 = vor.u32 %v227_v19, %v224_v18  ;;  %v238_v28 = vor.u32 %v237_v21, %v233_v20  ;;  %v1224_v30 = vshll.u32 %v3827_v16, 16  ;;  %v1207_v33 = vrot.slane %v1205_v23, 4  ;;  %v3860_v44 = vld [vmem:[%s3806_s6 + $0x14] sm:$0x1]  ;;  %v2918_v55 = vld [vmem:[%s3806_s6 + $0x18] sm:$0xf] }
  0x27   : > { %v1210_v34 = vrot.slane %v1208_v24, 5  ;;  %v1216_v35 = vrot.slane %v1214_v25, 5  ;;  %v1220_v40 = vrot.slane %v1218_v29, 4  ;;  %v246_v45 = vshrl.u32 %v3841_v31, 16  ;;  %v3873_v60 = vld [vmem:[%s3806_s6 + $0x1c] sm:$0xf] }
  0x28   : > { %v229_v38 = vrot.slane %v228_v27, 4  ;;  %v239_v39 = vrot.slane %v238_v28, 4  ;;  %v1226_v43 = vrot.slane %v1224_v30, 5  ;;  %v249_v46 = vshll.u32 %v3841_v31, 16  ;;  %v3881_v1 = vld [vmem:[%s3806_s6 + $0x20] sm:$0x1] }
  0x29   : > { %v1211_v42 = vor.u32 %v1210_v34, %v1207_v33  ;;  %v1221_v49 = vor.u32 %v1220_v40, %v1216_v35  ;;  %v255_v50 = vshll.u32 %v3850_v36, 16  ;;  %v248_v53 = vrot.slane %v246_v45, 4  ;;  %v3889_v21 = vld [vmem:[%s3806_s6 + $0x18] sm:$0xf]  ;;  %v3896_v27 = vld [vmem:[%s3806_s6 + $0x1c] sm:$0xf] }
  0x2a   : > { %v234_v47 = vsel %vm3845_vm4, %v229_v38, %v233_v20  ;;  %v244_v48 = vsel %vm3845_vm4, %v239_v39, %v243_v22  ;;  %v251_v54 = vrot.slane %v249_v46, 5  ;;  %v259_v58 = vshrl.u32 %v3850_v36, 16  ;;  %v3904_v38 = vld [vmem:[%s3806_s6 + $0x20] sm:$0x1]  ;;  %s2817_s8 = sshll.u32 %s177_s4, 7  ;;  %s4696_s25 = scalar_lea.sflag [#allocation3], %s177_s4 }
  0x2b   : > { %v2823_v51 = vcombine.low %v234_v47, %v244_v48  ;;  %v1212_v52 = vrot.slane %v1211_v42, 4  ;;  %v1222_v56 = vrot.slane %v1221_v49, 4  ;;  %v257_v57 = vrot.slane %v255_v50, 5  ;;  %v2921_v47 = vld [vmem:[%s3806_s6 + $0x24] sm:$0xf]  ;;  %s4654_s9 = scalar_lea.vmem [#allocation2], %s2817_s8 }
  0x2c   : > { %v265_v59 = vshll.u32 %v3860_v44, 16  ;;  %v1596_v62 = vrot.slane %v3824_v15, 5  ;;  %v1599_v63 = vrot.slane %v3827_v16, 5  ;;  %v252_v0 = vor.u32 %v251_v54, %v248_v53  ;;  %s2725_s20 = sshll.u32 %s4654_s9, 4  ;;  %s3593_s30 = sshll.u32 %s3685_s29, 4  ;;  %s4689_s20 = int_to_ptr.vmem [resolvable:$true] %s2725_s20  ;;  %s3594_s30 = int_to_ptr.vmem [resolvable:$false] %s3593_s30 }
  0x2d   : > { %3190 = vmatprep.mubr.msk.bf16.mxu1 %vm439_vm3, %v2823_v51  ;;  %v1217_v61 = vsel %vm3845_vm4, %v1212_v52, %v1216_v35  ;;  %v1227_v2 = vsel %vm3845_vm4, %v1222_v56, %v1226_v43  ;;  %v261_v4 = vrot.slane %v259_v58, 4  ;;  %v1229_v9 = vshrl.u32 %v2918_v55, 16  ;;  %v3914_v52 = vld [vmem:[%s3806_s6 + $0x28] sm:$0xf]  ;;  %s3589_s28 = scalar_lea.vmem %s4689_s20, 2048  ;;  %p3596_p2 = scmp.lt.s32.totalorder %s4689_s20, %s3594_s30 }
  0x2e   : > { %v267_v5 = vrot.slane %v265_v59, 5  ;;  %v2940_v10 = vcombine.low %v1217_v61, %v1227_v2  ;;  %v253_v11 = vrot.slane %v252_v0, 4  ;;  %v1232_v12 = vshll.u32 %v2918_v55, 16  ;;  %v3926_v61 = vld [vmem:[%s3806_s6 + $0x2c] sm:$0x1]  ;;  %p3590_p13 = scmp.ne.s32.totalorder %s4689_s20, %s3589_s28 }
  0x2f   : > { %v1238_v13 = vshll.u32 %v3873_v60, 16  ;;  %v262_v14 = vor.u32 %v261_v4, %v257_v57  ;;  %v1231_v18 = vrot.slane %v1229_v9, 4  ;;  %v1242_v19 = vshrl.u32 %v3873_v60, 16 }
  0x30   : > { %v1248_v20 = vshll.u32 %v3881_v1, 16  ;;  %3262 = vmatprep.mubr.msk.bf16.mxu0 %vm439_vm3, %v2940_v10  ;;  %v258_v22 = vsel %vm3845_vm4, %v253_v11, %v257_v57  ;;  %v1234_v23 = vrot.slane %v1232_v12, 5  ;;  %v1603_v25 = vrot.slane %v3873_v60, 5  ;;  %v3920_v57 = vld [vmem:[%s4749_s1 + $0x4] sm:$0x3]  ;;  %p3591_p0 = pnand %p3590_p13, %p3761_p5 }
  0x31   : > { %v1240_v24 = vrot.slane %v1238_v13, 5  ;;  %v263_v28 = vrot.slane %v262_v14, 4  ;;  %v1244_v29 = vrot.slane %v1242_v19, 4  ;;  %v1606_v33 = vrot.slane %v3881_v1, 5  ;;  %v3933_v11 = vld [vmem:[%s3806_s6 + $0x24] sm:$0xf] }
  0x32   : > { %v1250_v30 = vrot.slane %v1248_v20, 5  ;;  %v1235_v34 = vor.u32 %v1234_v23, %v1231_v18  ;;  %v3901_v35 = vrot.slane %v1603_v25, 4  ;;  %v270_v39 = vshrl.u32 %v3889_v21, 16  ;;  %v3936_v19 = vld [vmem:[%s3806_s6 + $0x28] sm:$0xf]  ;;  %p3592_p1 = pneg %p3591_p0 }
  0x33   : > { %v273_v40 = vshll.u32 %v3889_v21, 16  ;;  %v268_v42 = vsel %vm3845_vm4, %v263_v28, %v267_v5  ;;  %v1245_v43 = vor.u32 %v1244_v29, %v1240_v24  ;;  %v279_v45 = vshll.u32 %v3896_v27, 16  ;;  %v3946_v29 = vld [vmem:[%s3806_s6 + $0x2c] sm:$0x1] }
  0x34   : > { %v283_v46 = vshrl.u32 %v3896_v27, 16  ;;  %v2824_v48 = vcombine.low %v258_v22, %v268_v42  ;;  %v1236_v49 = vrot.slane %v1235_v34, 4  ;;  %v272_v50 = vrot.slane %v270_v39, 4 }
  0x35   : > { %v275_v51 = vrot.slane %v273_v40, 5  ;;  %v1246_v53 = vrot.slane %v1245_v43, 4  ;;  %v281_v54 = vrot.slane %v279_v45, 5  ;;  %v289_v56 = vshll.u32 %v3904_v38, 16  ;;  %v2924_v45 = vld [vmem:[%s3806_s6 + $0x30] sm:$0xf] }
  0x36   : > { %v285_v55 = vrot.slane %v283_v46, 4  ;;  %3191 = vmatmul.mubr.msk.bf16.vlgmr.msra.gmra.mrb[0].mxu1 %vm439_vm3, %v2824_v48  ;;  %v1241_v58 = vsel %vm3845_vm4, %v1236_v49, %v1240_v24  ;;  %v1253_v0 = vshrl.u32 %v2921_v47, 16  ;;  %v1256_v2 = vshll.u32 %v2921_v47, 16 }
  0x37   : > { %v276_v59 = vor.u32 %v275_v51, %v272_v50  ;;  %3207 = vmatpush3.bf16.msra.mxu1 %v3830_v17  ;;  %v1251_v4 = vsel %vm3845_vm4, %v1246_v53, %v1250_v30  ;;  %v291_v9 = vrot.slane %v289_v56, 5  ;;  %v1262_v10 = vshll.u32 %v3914_v52, 16  ;;  %v3956_v50 = vld [vmem:[%s3806_s6 + $0x34] sm:$0xf] }
  0x38   : > { %v286_v5 = vor.u32 %v285_v55, %v281_v54  ;;  %v2941_v12 = vcombine.low %v1241_v58, %v1251_v4  ;;  %v1255_v14 = vrot.slane %v1253_v0, 4  ;;  %v1258_v18 = vrot.slane %v1256_v2, 5  ;;  %3482 = vmatprep.subr.msk.bf16.mxu1 %vm464_vm0, %v3920_v57  ;;  %v3966_v58 = vld [vmem:[%s3806_s6 + $0x38] sm:$0x1] }
  0x39   : > { %v277_v13 = vrot.slane %v276_v59, 4  ;;  %v1264_v20 = vrot.slane %v1262_v10, 5  ;;  %v1266_v22 = vshrl.u32 %v3914_v52, 16  ;;  %v1272_v23 = vshll.u32 %v3926_v61, 16 }
  0x3a   : > { %v287_v17 = vrot.slane %v286_v5, 4  ;;  %3263 = vmatmul.mubr.msk.bf16.vlgmr.msra.gmra.mrb[0].mxu0 %vm439_vm3, %v2941_v12  ;;  %v1259_v28 = vor.u32 %v1258_v18, %v1255_v14  ;;  %v294_v30 = vshrl.u32 %v3933_v11, 16  ;;  %v297_v34 = vshll.u32 %v3933_v11, 16  ;;  %v3971_v14 = vld [vmem:[%s3806_s6 + $0x30] sm:$0xf] }
  0x3b   : > { %v282_v24 = vsel %vm3845_vm4, %v277_v13, %v281_v54  ;;  %3279 = vmatpush3.bf16.msra.mxu0 %v3853_v37  ;;  %v1268_v40 = vrot.slane %v1266_v22, 4  ;;  %v1274_v42 = vrot.slane %v1272_v23, 5  ;;  %v303_v43 = vshll.u32 %v3936_v19, 16  ;;  %v3977_v23 = vld [vmem:[%s3806_s6 + $0x34] sm:$0xf] }
  0x3c   : > { %v292_v39 = vsel %vm3845_vm4, %v287_v17, %v291_v9  ;;  %v1260_v47 = vrot.slane %v1259_v28, 4  ;;  %v296_v48 = vrot.slane %v294_v30, 4  ;;  %v299_v49 = vrot.slane %v297_v34, 5  ;;  %3487 = vmatprep.subr.msk.bf16.mxu0 %vm464_vm0, %v3836_v26 }
  0x3d   : > { %v2825_v46 = vcombine.low %v282_v24, %v292_v39  ;;  %v1269_v37 = vor.u32 %v1268_v40, %v1264_v20  ;;  %v305_v51 = vrot.slane %v303_v43, 5  ;;  %v307_v53 = vshrl.u32 %v3936_v19, 16  ;;  %v3982_v39 = vld [vmem:[%s3806_s6 + $0x38] sm:$0x1] }
  0x3e   : > { %v313_v54 = vshll.u32 %v3946_v29, 16  ;;  %v1265_v55 = vsel %vm3845_vm4, %v1260_v47, %v1264_v20  ;;  %v300_v56 = vor.u32 %v299_v49, %v296_v48  ;;  %v1277_v59 = vshrl.u32 %v2924_v45, 16 }
  0x3f   : > { %3194 = vmatprep.mubr.msk.bf16.mxu1 %vm439_vm3, %v2825_v46  ;;  %v1280_v0 = vshll.u32 %v2924_v45, 16  ;;  %v1270_v2 = vrot.slane %v1269_v37, 4  ;;  %v309_v26 = vrot.slane %v307_v53, 4  ;;  %v1286_v5 = vshll.u32 %v3956_v50, 16  ;;  %v2956_v37 = vld [vmem:[%s3806_s6 + $0xc] sm:$0xe] }
  0x40   : > { %v315_v4 = vrot.slane %v313_v54, 5  ;;  %v301_v9 = vrot.slane %v300_v56, 4  ;;  %v1279_v10 = vrot.slane %v1277_v59, 4  ;;  %v1290_v13 = vshrl.u32 %v3956_v50, 16  ;;  %v3994_v56 = vld [vmem:[%s3806_s6 + $0x3c] sm:$0xf] }
  0x41   : > { %v1282_v12 = vrot.slane %v1280_v0, 5  ;;  %v1275_v18 = vsel %vm3845_vm4, %v1270_v2, %v1274_v42  ;;  %v310_v17 = vor.u32 %v309_v26, %v305_v51  ;;  %v1288_v20 = vrot.slane %v1286_v5, 5 }
  0x42   : > { %v1296_v22 = vshll.u32 %v3966_v58, 16  ;;  %v2942_v24 = vcombine.low %v1265_v55, %v1275_v18  ;;  %v306_v28 = vsel %vm3845_vm4, %v301_v9, %v305_v51  ;;  %v1292_v34 = vrot.slane %v1290_v13, 4  ;;  %v4008_v18 = vld [vmem:[%s3806_s6 + $0x44] sm:$0x1] }
  0x43   : > { %v1283_v30 = vor.u32 %v1282_v12, %v1279_v10  ;;  %v311_v40 = vrot.slane %v310_v17, 4  ;;  %v318_v42 = vshrl.u32 %v3971_v14, 16  ;;  %v321_v45 = vshll.u32 %v3971_v14, 16  ;;  %v2957_v17 = vld [vmem:[%s3806_s6 + $0x18] sm:$0xe] }
  0x44   : > { %v1298_v43 = vrot.slane %v1296_v22, 5  ;;  %3266 = vmatprep.mubr.msk.bf16.mxu0 %vm439_vm3, %v2942_v24  ;;  %v1293_v47 = vor.u32 %v1292_v34, %v1288_v20  ;;  %v327_v48 = vshll.u32 %v3977_v23, 16  ;;  %v331_v49 = vshrl.u32 %v3977_v23, 16 }
  0x45   : > { %v1284_v46 = vrot.slane %v1283_v30, 4  ;;  %v316_v51 = vsel %vm3845_vm4, %v311_v40, %v315_v4  ;;  %v320_v53 = vrot.slane %v318_v42, 4  ;;  %v323_v54 = vrot.slane %v321_v45, 5  ;;  %v4005_v4 = vld [vmem:[%s3806_s6 + $0x40] sm:$0xf] }
  0x46   : > { %v337_v55 = vshll.u32 %v3982_v39, 16  ;;  %v2826_v59 = vcombine.low %v306_v28, %v316_v51  ;;  %v1294_v2 = vrot.slane %v1293_v47, 4  ;;  %v329_v26 = vrot.slane %v327_v48, 5  ;;  %v4019_v30 = vld [vmem:[%s3806_s6 + $0x48] sm:$0xf] }
  0x47   : > { %v1289_v0 = vsel %vm3845_vm4, %v1284_v46, %v1288_v20  ;;  %v324_v9 = vor.u32 %v323_v54, %v320_v53  ;;  %v333_v10 = vrot.slane %v331_v49, 4  ;;  %v2964_v13 = vrot.slane %v2956_v37, 9 }
  0x48   : > { %v339_v12 = vrot.slane %v337_v55, 5  ;;  %3195 = vmatmul.mubr.msk.bf16.gmra.mrb[4].mxu1 %vm439_vm3, %v2826_v59  ;;  %v1299_v20 = vsel %vm3845_vm4, %v1294_v2, %v1298_v43  ;;  %v1598_v22 = vrot.slane %v1596_v62, 4  ;;  %v342_v24 = vshrl.u32 %v3994_v56, 16  ;;  %v4039_v55 = vld [vmem:[%s3806_s6 + $0x50] sm:$0x1] }
  0x49   : > { %v345_v28 = vshll.u32 %v3994_v56, 16  ;;  %v2943_v34 = vcombine.low %v1289_v0, %v1299_v20  ;;  %v325_v40 = vrot.slane %v324_v9, 4  ;;  %v334_v42 = vor.u32 %v333_v10, %v329_v26 }
  0x4a   : > { %v1597_v45 = vsel %vm4000_vm7, %v2964_v13, %v1596_v62  ;;  %v1600_v43 = vsel %vm4000_vm7, %v1598_v22, %v1599_v63  ;;  %v344_v46 = vrot.slane %v342_v24, 4  ;;  %v351_v48 = vshll.u32 %v4005_v4, 16  ;;  %v4035_v62 = vld [vmem:[%s3806_s6 + $0x4c] sm:$0xf] }
  0x4b   : > { %v347_v47 = vrot.slane %v345_v28, 5  ;;  %3267 = vmatmul.mubr.msk.bf16.gmra.mrb[4].mxu0 %vm439_vm3, %v2943_v34  ;;  %v330_v49 = vsel %vm3845_vm4, %v325_v40, %v329_v26  ;;  %v335_v37 = vrot.slane %v334_v42, 4  ;;  %v2973_v15 = vcombine.low %v1597_v45, %v1600_v43  ;;  %v4057_v28 = vld [vmem:[%s3806_s6 + $0x54] sm:$0xf]  ;;  %v4068_v34 = vld [vmem:[%s4749_s1 + $0xe] sm:$0x3] }
  0x4c   : > { %v355_v51 = vshrl.u32 %v4005_v4, 16  ;;  %v353_v53 = vrot.slane %v351_v48, 5  ;;  %v361_v63 = vshll.u32 %v4008_v18, 16  ;;  %v2965_v54 = vrot.slane %v2957_v17, 9 }
  0x4d   : > { %v348_v16 = vor.u32 %v347_v47, %v344_v46  ;;  %v340_v59 = vsel %vm3845_vm4, %v335_v37, %v339_v12  ;;  %3280 = vmatprep.mubr.msk.bf16.mxu0 %vm439_vm3, %v2973_v15  ;;  %v1607_v2 = vsel %vm4000_vm7, %v3901_v35, %v1606_v33  ;;  %v366_v26 = vshrl.u32 %v4019_v30, 16  ;;  %v2958_v12 = vld [vmem:[%s3806_s6 + $0x24] sm:$0xe]  ;;  %v4073_v37 = vld [vmem:[%s3806_s6 + $0x58] sm:$0xf] }
  0x4e   : > { %v357_v0 = vrot.slane %v355_v51, 4  ;;  %v2827_v9 = vcombine.low %v330_v49, %v340_v59  ;;  %v363_v13 = vrot.slane %v361_v63, 5  ;;  %v1604_v17 = vsel %vm4000_vm7, %v2965_v54, %v1603_v25  ;;  %v4082_v54 = vld [vmem:[%s3806_s6 + $0x5c] sm:$0x1] }
  0x4f   : > { %v349_v10 = vrot.slane %v348_v16, 4  ;;  %v2974_v22 = vcombine.low %v1604_v17, %v1607_v2  ;;  %v368_v24 = vrot.slane %v366_v26, 4  ;;  %v369_v1 = vshll.u32 %v4019_v30, 16 }
  0x50   : > { %v358_v20 = vor.u32 %v357_v0, %v353_v53  ;;  %3198 = vmatprep.mubr.msk.bf16.mxu1 %vm439_vm3, %v2827_v9  ;;  %v375_v35 = vshll.u32 %v4035_v62, 16  ;;  %v379_v60 = vshrl.u32 %v4035_v62, 16  ;;  %v385_v25 = vshll.u32 %v4039_v55, 16 }
  0x51   : > { %v354_v33 = vsel %vm3845_vm4, %v349_v10, %v353_v53  ;;  %v371_v42 = vrot.slane %v369_v1, 5  ;;  %v2966_v45 = vrot.slane %v2958_v12, 9  ;;  %v1610_v43 = vrot.slane %v3914_v52, 5  ;;  %v2959_v10 = vld [vmem:[%s3806_s6 + $0x30] sm:$0xe] }
  0x52   : > { %v359_v40 = vrot.slane %v358_v20, 4  ;;  %v377_v46 = vrot.slane %v375_v35, 5  ;;  %v381_v47 = vrot.slane %v379_v60, 4  ;;  %v387_v48 = vrot.slane %v385_v25, 5 }
  0x53   : > { %v1613_v49 = vrot.slane %v3926_v61, 5  ;;  %3281 = vmatmul.mubr.msk.bf16.vlgmr.msra.gmra.mrb[0].mxu0 %vm439_vm3, %v2974_v22  ;;  %v372_v51 = vor.u32 %v371_v42, %v368_v24  ;;  %v1611_v16 = vsel %vm4000_vm7, %v2966_v45, %v1610_v43  ;;  %v1612_v53 = vrot.slane %v1610_v43, 4  ;;  %v4103_v42 = vld [vmem:[%s3806_s6 + $0x40] sm:$0xf]  ;;  %v4106_v45 = vld [vmem:[%s3806_s6 + $0x44] sm:$0x1] }
  0x54   : > { %v364_v15 = vsel %vm3845_vm4, %v359_v40, %v363_v13  ;;  %3297 = vmatpush3.bf16.msra.mxu0 %v3857_v41  ;;  %v382_v52 = vor.u32 %v381_v47, %v377_v46  ;;  %v390_v61 = vshrl.u32 %v4057_v28, 16  ;;  %v393_v59 = vshll.u32 %v4057_v28, 16 }
  0x55   : > { %v2828_v63 = vcombine.low %v354_v33, %v364_v15  ;;  %v373_v0 = vrot.slane %v372_v51, 4  ;;  %v1614_v2 = vsel %vm4000_vm7, %v1612_v53, %v1613_v49  ;;  %v399_v26 = vshll.u32 %v4073_v37, 16  ;;  %3488 = vmatprep.subr.msk.bf16.mxu0 %vm464_vm0, %v4068_v34  ;;  %v2960_v33 = vld [vmem:[%s3806_s6 + $0x3c] sm:$0xe] }
  0x56   : > { %v403_v9 = vshrl.u32 %v4073_v37, 16  ;;  %v383_v41 = vrot.slane %v382_v52, 4  ;;  %v2975_v13 = vcombine.low %v1611_v16, %v1614_v2  ;;  %v392_v17 = vrot.slane %v390_v61, 4  ;;  %v2961_v2 = vld [vmem:[%s3806_s6 + $0x48] sm:$0xe] }
  0x57   : > { %3199 = vmatmul.mubr.msk.bf16.gmra.mrb[8].mxu1 %vm439_vm3, %v2828_v63  ;;  %v395_v12 = vrot.slane %v393_v59, 5  ;;  %v378_v20 = vsel %vm3845_vm4, %v373_v0, %v377_v46  ;;  %v401_v22 = vrot.slane %v399_v26, 5  ;;  %v409_v1 = vshll.u32 %v4082_v54, 16  ;;  %v4121_v59 = vld [vmem:[%s3806_s6 + $0x4c] sm:$0xf] }
  0x58   : > { %v405_v24 = vrot.slane %v403_v9, 4  ;;  %v388_v35 = vsel %vm3845_vm4, %v383_v41, %v387_v48  ;;  %3284 = vmatprep.mubr.msk.bf16.mxu0 %vm439_vm3, %v2975_v13  ;;  %v2967_v25 = vrot.slane %v2959_v10, 9  ;;  %v1617_v40 = vrot.slane %v3956_v50, 5  ;;  %v4124_v0 = vld [vmem:[%s3806_s6 + $0x50] sm:$0x1] }
  0x59   : > { %v396_v60 = vor.u32 %v395_v12, %v392_v17  ;;  %v2829_v43 = vcombine.low %v378_v20, %v388_v35  ;;  %v411_v47 = vrot.slane %v409_v1, 5  ;;  %v1620_v49 = vrot.slane %v3966_v58, 5  ;;  %v4132_v17 = vld [vmem:[%s3806_s6 + $0x58] sm:$0xf]  ;;  %v4135_v12 = vld [vmem:[%s3806_s6 + $0x5c] sm:$0x1] }
  0x5a   : > { %v406_v46 = vor.u32 %v405_v24, %v401_v22  ;;  %v1618_v48 = vsel %vm4000_vm7, %v2967_v25, %v1617_v40  ;;  %v1619_v51 = vrot.slane %v1617_v40, 4  ;;  %v2968_v16 = vrot.slane %v2960_v33, 9  ;;  %4763 = vst [vmem:[#allocation5_spill] sm:$0xff] %v4135_v12  ;;  %v4145_v35 = vld [vmem:[%s3806_s6 + $0x64] sm:$0xf] }
  0x5b   : > { %v397_v15 = vrot.slane %v396_v60, 4  ;;  %3202 = vmatprep.mubr.msk.bf16.mxu1 %vm439_vm3, %v2829_v43  ;;  %v1624_v53 = vrot.slane %v4103_v42, 5  ;;  %v1627_v63 = vrot.slane %v4106_v45, 5  ;;  %v2839_v61 = vcombine.low %v3809_v6, %v3812_v7  ;;  %v2962_v6 = vld [vmem:[%s3806_s6 + $0x54] sm:$0xe]  ;;  %4764 = vst [vmem:[#allocation6_spill] sm:$0xff] %v4145_v35 }
  0x5c   : > { %v407_v50 = vrot.slane %v406_v46, 4  ;;  %v1621_v58 = vsel %vm4000_vm7, %v1619_v51, %v1620_v49  ;;  %v1631_v24 = vrot.slane %v4121_v59, 5  ;;  %v1634_v1 = vrot.slane %v4124_v0, 5  ;;  %v4148_v60 = vld [vmem:[%s3806_s6 + $0x68] sm:$0x1] }
  0x5d   : > { %v402_v52 = vsel %vm3845_vm4, %v397_v15, %v401_v22  ;;  %v2976_v9 = vcombine.low %v1618_v48, %v1621_v58  ;;  %v1625_v10 = vsel %vm4000_vm7, %v2968_v16, %v1624_v53  ;;  %v1626_v41 = vrot.slane %v1624_v53, 4  ;;  %4765 = vst [vmem:[#allocation7_spill] sm:$0xff] %v4148_v60 }
  0x5e   : > { %v412_v26 = vsel %vm3845_vm4, %v407_v50, %v411_v47  ;;  %v2969_v22 = vrot.slane %v2961_v2, 9  ;;  %v1633_v40 = vrot.slane %v1631_v24, 4  ;;  %v2970_v43 = vrot.slane %v2962_v6, 9  ;;  %v2963_v47 = vld [vmem:[%s3806_s6 + $0x60] sm:$0xe] }
  0x5f   : > { %v2830_v13 = vcombine.low %v402_v52, %v412_v26  ;;  %3285 = vmatmul.mubr.msk.bf16.gmra.mrb[4].mxu0 %vm439_vm3, %v2976_v9  ;;  %v1628_v20 = vsel %vm4000_vm7, %v1626_v41, %v1627_v63  ;;  %v1638_v46 = vrot.slane %v4132_v17, 5  ;;  %v765_v49 = vrot.slane %v3850_v36, 5  ;;  %v731_v2 = vld [vmem:[%s3806_s6 + $0x18] sm:$0xe]  ;;  %v4180_v6 = vld [vmem:[%s4749_s1 + $0x6] sm:$0x3] }
  0x60   : > { %v2977_v33 = vcombine.low %v1625_v10, %v1628_v20  ;;  %v1632_v25 = vsel %vm4000_vm7, %v2969_v22, %v1631_v24  ;;  %v1641_v15 = vrot.slane %v4135_v12, 5  ;;  %v1635_v48 = vsel %vm4000_vm7, %v1633_v40, %v1634_v1  ;;  %v733_v1 = vld [vmem:[%s3806_s6 + $0x30] sm:$0xe] }
  0x61   : > { %3203 = vmatmul.mubr.msk.bf16.gmra.mrb[12].mxu1 %vm439_vm3, %v2830_v13  ;;  %v1639_v51 = vsel %vm4000_vm7, %v2970_v43, %v1638_v46  ;;  %v1640_v16 = vrot.slane %v1638_v46, 4  ;;  %v1645_v50 = vrot.slane %v4145_v35, 5  ;;  %v2840_v53 = vcombine.low %v3841_v31, %v3850_v36  ;;  %v732_v36 = vld [vmem:[%s3806_s6 + $0x24] sm:$0xe]  ;;  %v4454_v12 = vld [vmem:[%s3806_s6 + $0x70] sm:$0xf] }
  0x62   : > { %3208 = vmatprep.mubr.msk.bf16.mxu1 %vm439_vm3, %v2839_v61  ;;  %3288 = vmatprep.mubr.msk.bf16.mxu0 %vm439_vm3, %v2977_v33  ;;  %v2978_v63 = vcombine.low %v1632_v25, %v1635_v48  ;;  %v2971_v52 = vrot.slane %v2963_v47, 9  ;;  %v1648_v58 = vrot.slane %v4148_v60, 5  ;;  %v730_v61 = vld [vmem:[%s3806_s6 + $0xc] sm:$0xe]  ;;  %v768_v26 = vrot.slane %v3860_v44, 5 }
  0x63   : > { %v2841_v9 = vcombine.low %v3889_v21, %v3896_v27  ;;  %v1642_v10 = vsel %vm4000_vm7, %v1640_v16, %v1641_v15  ;;  %v1647_v41 = vrot.slane %v1645_v50, 4  ;;  %v863_v13 = vsel %vm464_vm0, %v3920_v57, 0  ;;  %v3569_v16 = vld [vmem:[%s3806_s6 + $0x18] sm:$0xff]   ;;  %v4426_v60 = vld [vmem:[%s3806_s6 + $0x64] sm:$0xf] }
  0x64   : > { %v2979_v31 = vcombine.low %v1639_v51, %v1642_v10  ;;  %v2856_v44 = vrot.slane %v730_v61, 9  ;;  %v767_v20 = vrot.slane %v765_v49, 4  ;;  %v2857_v21 = vrot.slane %v731_v2, 9  ;;  %4766 = vst [vmem:[#allocation8_spill] sm:$0xff] %v4426_v60 }
  0x65   : > { %v1646_v22 = vsel %vm4000_vm7, %v2971_v52, %v1645_v50  ;;  %v1649_v57 = vsel %vm4000_vm7, %v1647_v41, %v1648_v58  ;;  %v772_v24 = vrot.slane %v3896_v27, 5  ;;  %v775_v40 = vrot.slane %v3904_v38, 5 }
  0x66   : > { %v4193_v33 = vsel %vm4000_vm7, %v2856_v44, %v765_v49  ;;  %v4197_v25 = vsel %vm4000_vm7, %v767_v20, %v768_v26  ;;  %v2858_v43 = vrot.slane %v732_v36, 9  ;;  %v2980_v49 = vcombine.low %v1646_v22, %v1649_v57  ;;  %v3024_v26 = vld [vmem:[%s3806_s6 + $0x18] sm:$0xf]  ;;  %v3571_v57 = vld [vmem:[%s3806_s6 + $0x24] sm:$0xff]  }
  0x67   : > { %3289 = vmatmul.mubr.msk.bf16.gmra.mrb[8].mxu0 %vm439_vm3, %v2978_v63  ;;  %v2865_v27 = vcombine.low %v4193_v33, %v4197_v25  ;;  %v4206_v46 = vsel %vm4000_vm7, %v2857_v21, %v772_v24  ;;  %v774_v47 = vrot.slane %v772_v24, 4  ;;  %v779_v15 = vrot.slane %v3936_v19, 5 }
  0x68   : > { %3292 = vmatprep.mubr.msk.bf16.mxu0 %vm439_vm3, %v2979_v31  ;;  %v782_v48 = vrot.slane %v3946_v29, 5  ;;  %v2859_v38 = vrot.slane %v733_v1, 9  ;;  %v2842_v51 = vcombine.low %v3933_v11, %v3936_v19  ;;  %v789_v63 = vrot.slane %v3982_v39, 5  ;;  %v734_v19 = vld [vmem:[%s3806_s6 + $0x3c] sm:$0xe] }
  0x69   : > { %3209 = vmatmul.mubr.msk.bf16.vlgmr.msra.gmra.mrb[0].mxu1 %vm439_vm3, %v2840_v53  ;;  %v4215_v50 = vsel %vm4000_vm7, %v774_v47, %v775_v40  ;;  %v786_v53 = vrot.slane %v3977_v23, 5  ;;  %v2843_v52 = vcombine.low %v3971_v14, %v3977_v23  ;;  %v4225_v58 = vsel %vm4000_vm7, %v2858_v43, %v779_v15  ;;  %v729_v14 = vld [vmem:[%s3806_s6] sm:$0xe]  ;;  %v4253_v31 = vld [vmem:[%s3806_s6 + $0x1c] sm:$0xf] }
  0x6a   : > { %3225 = vmatpush3.bf16.msra.mxu1 %v863_v13  ;;  %3212 = vmatprep.mubr.msk.bf16.mxu1 %vm439_vm3, %v2841_v9  ;;  %v2866_v29 = vcombine.low %v4206_v46, %v4215_v50  ;;  %v781_v11 = vrot.slane %v779_v15, 4  ;;  %v758_v61 = vrot.slane %v3812_v7, 5  ;;  %v2860_v10 = vrot.slane %v734_v19, 9  ;;  %v735_v1 = vld [vmem:[%s3806_s6 + $0x48] sm:$0xe] }
  0x6b   : > { %3483 = vmatprep.subr.msk.bf16.mxu1 %vm464_vm0, %v4180_v6  ;;  %v4231_v2 = vsel %vm4000_vm7, %v2859_v38, %v786_v53  ;;  %v788_v39 = vrot.slane %v786_v53, 4  ;;  %v761_v41 = vrot.slane %v3815_v8, 5  ;;  %v2855_v36 = vrot.slane %v729_v14, 9  ;;  %v4279_v38 = vld [vmem:[%s4749_s1 + $0x10] sm:$0x3] }
  0x6c   : > { %v4237_v23 = vsel %vm4000_vm7, %v781_v11, %v782_v48  ;;  %v760_v44 = vrot.slane %v758_v61, 4  ;;  %v793_v20 = vrot.slane %v4005_v4, 5  ;;  %v796_v21 = vrot.slane %v4008_v18, 5  ;;  %v4300_v14 = vld [vmem:[%s3806_s6 + $0x28] sm:$0xf] }
  0x6d   : > { %v4246_v9 = vsel %vm4000_vm7, %v788_v39, %v789_v63  ;;  %v2844_v22 = vcombine.low %v3994_v56, %v4005_v4  ;;  %v2043_v24 = vshrl.u32 %v3024_v26, 16  ;;  %v2046_v8 = vshll.u32 %v3024_v26, 16  ;;  %v3573_v4 = vld [vmem:[%s3806_s6 + $0x30] sm:$0xff]   ;;  %v4402_v46 = vld [vmem:[%s3806_s6 + $0x44] sm:$0x1] }
  0x6e   : > { %v2052_v40 = vshll.u32 %v4253_v31, 16  ;;  %v2056_v43 = vshrl.u32 %v4253_v31, 16  ;;  %v4265_v47 = vsel %vm4000_vm7, %v2860_v10, %v793_v20  ;;  %v2285_v18 = vsel %vm464_vm0, %v4068_v34, 0  ;;  %v3042_v7 = vld [vmem:[%s3806_s6 + $0x60] sm:$0xf] }
  0x6f   : > { %3293 = vmatmul.mubr.msk.bf16.gmra.mrb[12].mxu0 %vm439_vm3, %v2980_v49  ;;  %v795_v49 = vrot.slane %v793_v20, 4  ;;  %v2845_v56 = vcombine.low %v4019_v30, %v4035_v62  ;;  %v759_v15 = vsel %vm4000_vm7, %v2855_v36, %v758_v61  ;;  %v762_v48 = vsel %vm4000_vm7, %v760_v44, %v761_v41  ;;  %v4287_v30 = vld [vmem:[%s3806_s6 + $0x20] sm:$0x1]  ;;  %v3027_v61 = vld [vmem:[%s3806_s6 + $0x24] sm:$0xf] }
  0x70   : > { %3298 = vmatprep.mubr.msk.bf16.mxu0 %vm439_vm3, %v3569_v16  ;;  %v2861_v34 = vrot.slane %v735_v1, 9  ;;  %v2045_v16 = vrot.slane %v2043_v24, 4  ;;  %v2048_v53 = vrot.slane %v2046_v8, 5  ;;  %v4293_v11 = vrot.slane %v2052_v40, 5  ;;  %v736_v44 = vld [vmem:[%s3806_s6 + $0x54] sm:$0xe] }
  0x71   : > { %3213 = vmatmul.mubr.msk.bf16.gmra.mrb[4].mxu1 %vm439_vm3, %v2842_v51  ;;  %v4283_v51 = vsel %vm4000_vm7, %v795_v49, %v796_v21  ;;  %v2058_v19 = vrot.slane %v2056_v43, 4  ;;  %v803_v39 = vrot.slane %v4039_v55, 5  ;;  %v2846_v10 = vcombine.low %v4057_v28, %v4073_v37  ;;  %v3030_v55 = vld [vmem:[%s3806_s6 + $0x30] sm:$0xf]  ;;  %v3575_v20 = vld [vmem:[%s3806_s6 + $0x3c] sm:$0xff]   ;;  %v3576_v1 = vld [vmem:[%s3806_s6 + $0x48] sm:$0xff]  }
  0x72   : > { %3216 = vmatprep.mubr.msk.bf16.mxu1 %vm439_vm3, %v2843_v52  ;;  %v800_v52 = vrot.slane %v4035_v62, 5  ;;  %v2864_v41 = vcombine.low %v759_v15, %v762_v48  ;;  %v2062_v36 = vshll.u32 %v4287_v30, 16  ;;  %v2049_v21 = vor.u32 %v2048_v53, %v2045_v16  ;;  %v4319_v8 = vld [vmem:[%s3806_s6 + $0x34] sm:$0xf] }
  0x73   : > { %v2059_v28 = vor.u32 %v2058_v19, %v4293_v11  ;;  %v2076_v40 = vshll.u32 %v4300_v14, 16  ;;  %v2080_v43 = vshrl.u32 %v4300_v14, 16  ;;  %v807_v15 = vrot.slane %v4073_v37, 5 }
  0x74   : > { %v4304_v62 = vsel %vm4000_vm7, %v2861_v34, %v800_v52  ;;  %v802_v26 = vrot.slane %v800_v52, 4  ;;  %v2100_v48 = vshll.u32 %v4319_v8, 16  ;;  %v2104_v34 = vshrl.u32 %v4319_v8, 16 }
  0x75   : > { %v810_v16 = vrot.slane %v4082_v54, 5  ;;  %v2050_v53 = vrot.slane %v2049_v21, 4  ;;  %v2064_v52 = vrot.slane %v2062_v36, 5  ;;  %v2060_v37 = vrot.slane %v2059_v28, 4  ;;  %v4342_v36 = vld [vmem:[%s3806_s6 + $0x2c] sm:$0x1] }
  0x76   : > { %v4316_v24 = vsel %vm4000_vm7, %v802_v26, %v803_v39  ;;  %v4338_v26 = vrot.slane %v2076_v40, 5  ;;  %v4349_v21 = vld [vmem:[%s3806_s6 + $0x38] sm:$0x1]  ;;  %v1065_v28 = vsel %vm464_vm0, %v4180_v6, 0 }
  0x77   : > { %3299 = vmatmul.mubr.msk.bf16.vlgmr.msra.gmra.mrb[0].mxu0 %vm439_vm3, %v3571_v57  ;;  %v2070_v57 = vshll.u32 %v3027_v61, 16  ;;  %v3577_v40 = vld [vmem:[%s3806_s6 + $0x54] sm:$0xff]  }
  0x78   : > { %3315 = vmatpush3.bf16.msra.mxu0 %v2285_v18  ;;  %3302 = vmatprep.mubr.msk.bf16.mxu0 %vm439_vm3, %v3573_v4  ;;  %v2091_v18 = vshrl.u32 %v3030_v55, 16  ;;  %v2862_v4 = vrot.slane %v736_v44, 9 }
  0x79   : > { %3217 = vmatmul.mubr.msk.bf16.gmra.mrb[8].mxu1 %vm439_vm3, %v2844_v22  ;;  %3489 = vmatprep.subr.msk.bf16.mxu0 %vm464_vm0, %v4279_v38  ;;  %v2067_v22 = vshrl.u32 %v3027_v61, 16  ;;  %v809_v61 = vrot.slane %v807_v15, 4  ;;  %v2072_v54 = vrot.slane %v2070_v57, 5  ;;  %v2106_v57 = vrot.slane %v2104_v34, 4  ;;  %v3036_v34 = vld [vmem:[%s3806_s6 + $0x48] sm:$0xf] }
  0x7a   : > { %3220 = vmatprep.mubr.msk.bf16.mxu1 %vm439_vm3, %v2845_v56  ;;  %v2094_v56 = vshll.u32 %v3030_v55, 16  ;;  %v4334_v19 = vsel %vm4000_vm7, %v2862_v4, %v807_v15  ;;  %v2082_v55 = vrot.slane %v2080_v43, 4  ;;  %v2093_v44 = vrot.slane %v2091_v18, 4  ;;  %v4360_v43 = vld [vmem:[%s3806_s6 + $0x40] sm:$0xf] }
  0x7b   : > { %v2069_v39 = vrot.slane %v2067_v22, 4  ;;  %v4351_v22 = vrot.slane %v2100_v48, 5  ;;  %v3578_v18 = vld [vmem:[%s3806_s6 + $0x60] sm:$0xff]   ;;  %v2065_v4 = vsel %vm3845_vm4, %v2060_v37, %v2064_v52  ;;  %v2086_v48 = vshll.u32 %v4342_v36, 16 }
  0x7c   : > { %v2139_v52 = vshrl.u32 %v3036_v34, 16  ;;  %v2142_v37 = vshll.u32 %v3036_v34, 16 }
  0x7d   : > { %v2073_v15 = vor.u32 %v2072_v54, %v2069_v39  ;;  %v2107_v63 = vor.u32 %v2106_v57, %v4351_v22  ;;  %v3039_v57 = vld [vmem:[%s3806_s6 + $0x54] sm:$0xf] }
  0x7e   : > { %v2141_v50 = vrot.slane %v2139_v52, 4  ;;  %v2166_v34 = vshll.u32 %v3039_v57, 16 }
  0x7f   : > { %3303 = vmatmul.mubr.msk.bf16.gmra.mrb[4].mxu0 %vm439_vm3, %v3575_v20  ;;  %v2096_v20 = vrot.slane %v2094_v56, 5  ;;  %v2055_v56 = vsel %vm3845_vm4, %v2050_v53, %v4293_v11  ;;  %v2124_v11 = vshll.u32 %v4360_v43, 16  ;;  %v2128_v53 = vshrl.u32 %v4360_v43, 16 }
  0x80   : > { %3306 = vmatprep.mubr.msk.bf16.mxu0 %vm439_vm3, %v3576_v1  ;;  %v2110_v1 = vshll.u32 %v4349_v21, 16  ;;  %v3049_v54 = vcombine.low %v2055_v56, %v2065_v4  ;;  %v2108_v56 = vrot.slane %v2107_v63, 4  ;;  %v4407_v63 = vld [vmem:[%s3806_s6 + $0x50] sm:$0x1] }
  0x81   : > { %3221 = vmatmul.mubr.msk.bf16.gmra.mrb[12].mxu1 %vm439_vm3, %v2846_v10  ;;  %v4346_v10 = vsel %vm4000_vm7, %v809_v61, %v810_v16  ;;  %v4371_v16 = vld [vmem:[%s3806_s6 + $0x4c] sm:$0xf]  ;;  %v2083_v61 = vor.u32 %v2082_v55, %v4338_v26  ;;  %v2097_v6 = vor.u32 %v2096_v20, %v2093_v44  ;;  %v2074_v55 = vrot.slane %v2073_v15, 4 }
  0x82   : > { %3226 = vmatprep.mubr.msk.bf16.mxu1 %vm439_vm3, %v2864_v41  ;;  %v3033_v41 = vld [vmem:[%s3806_s6 + $0x3c] sm:$0xf]  ;;  %v2148_v39 = vshll.u32 %v4371_v16, 16  ;;  %v2088_v44 = vrot.slane %v2086_v48, 5  ;;  %v2152_v20 = vshrl.u32 %v4371_v16, 16  ;;  %v2112_v33 = vrot.slane %v2110_v1, 5 }
  0x83   : > { %v2115_v49 = vshrl.u32 %v3033_v41, 16  ;;  %v2118_v13 = vshll.u32 %v3033_v41, 16  ;;  %v2084_v41 = vrot.slane %v2083_v61, 4  ;;  %v4395_v15 = vrot.slane %v2124_v11, 5 }
  0x84   : > { %v2130_v48 = vrot.slane %v2128_v53, 4  ;;  %v2163_v1 = vshrl.u32 %v3039_v57, 16  ;;  %v1334_v11 = vshll.u32 %v4121_v59, 16  ;;  %v2079_v53 = vsel %vm3845_vm4, %v2074_v55, %v4338_v26 }
  0x85   : > { %v2117_v25 = vrot.slane %v2115_v49, 4  ;;  %v2120_v4 = vrot.slane %v2118_v13, 5  ;;  %v4404_v49 = vrot.slane %v2148_v39, 5  ;;  %v2154_v13 = vrot.slane %v2152_v20, 4 }
  0x86   : > { %v2089_v52 = vsel %vm3845_vm4, %v2084_v41, %v2088_v44  ;;  %v2131_v57 = vor.u32 %v2130_v48, %v4395_v15  ;;  %v2113_v26 = vsel %vm3845_vm4, %v2108_v56, %v2112_v33  ;;  %v2165_v44 = vrot.slane %v2163_v1, 4  ;;  %v4445_v56 = vld [vmem:[%s3806_s6 + $0x5c] sm:$0x1] }
  0x87   : > { %3307 = vmatmul.mubr.msk.bf16.gmra.mrb[8].mxu0 %vm439_vm3, %v3577_v40  ;;  %v2098_v40 = vrot.slane %v2097_v6, 4  ;;  %v2121_v20 = vor.u32 %v2120_v4, %v2117_v25  ;;  %v2155_v41 = vor.u32 %v2154_v13, %v4404_v49  ;;  %v4768_v33 = vcombine.low %v4231_v2, %v4246_v9 }
  0x88   : > { %3310 = vmatprep.mubr.msk.bf16.mxu0 %vm439_vm3, %v3578_v18  ;;  %v3579_v18 = vld [vmem:[%s3806_s6 + $0x6c] sm:$0xff]   ;;  %v2187_v4 = vshrl.u32 %v3042_v7, 16  ;;  %v1338_v48 = vshrl.u32 %v4121_v59, 16  ;;  %v3050_v13 = vcombine.low %v2079_v53, %v2089_v52 }
  0x89   : > { %3227 = vmatmul.mubr.msk.bf16.vlgmr.msra.gmra.mrb[0].mxu1 %vm439_vm3, %v2865_v27  ;;  %v4392_v27 = vld [vmem:[%s3806_s6 + $0x58] sm:$0xf]  ;;  %v2103_v39 = vsel %vm3845_vm4, %v2098_v40, %v4351_v22  ;;  %v4767_v22 = vcombine.low %v4225_v58, %v4237_v23  ;;  %v2168_v40 = vrot.slane %v2166_v34, 5  ;;  %v2190_v58 = vshll.u32 %v3042_v7, 16 }
  0x8a   : > { %3243 = vmatpush3.bf16.msra.mxu1 %v1065_v28  ;;  %3230 = vmatprep.mubr.msk.bf16.mxu1 %vm439_vm3, %v2866_v29  ;;  %v3588_v28 = vld [vmem:[%s4749_s1 + $0x8] sm:$0x3]  ;;  %v2144_v29 = vrot.slane %v2142_v37, 5  ;;  %v2172_v61 = vshll.u32 %v4392_v27, 16  ;;  %v2176_v6 = vshrl.u32 %v4392_v27, 16  ;;  %v2539_v37 = vsel %vm464_vm0, %v4279_v38, 0 }
  0x8b   : > { %3485 = vmatprep.subr.msk.bf16.mxu1 %vm464_vm0, %v3588_v28  ;;  %v2134_v28 = vshll.u32 %v4402_v46, 16  ;;  %v2158_v38 = vshll.u32 %v4407_v63, 16  ;;  %v2196_v23 = vshll.u32 %v4426_v60, 16  ;;  %v3051_v34 = vcombine.low %v2103_v39, %v2113_v26 }
  0x8c   : > { %v2145_v55 = vor.u32 %v2144_v29, %v2141_v50  ;;  %v4438_v25 = vrot.slane %v2172_v61, 5  ;;  %v2122_v50 = vrot.slane %v2121_v20, 4  ;;  %v2132_v29 = vrot.slane %v2131_v57, 4 }
  0x8d   : > { %v2136_v1 = vrot.slane %v2134_v28, 5  ;;  %v2160_v9 = vrot.slane %v2158_v38, 5  ;;  %v2156_v61 = vrot.slane %v2155_v41, 4  ;;  %v2182_v7 = vshll.u32 %v4445_v56, 16  ;;  %v4466_v28 = vld [vmem:[%s3806_s6 + $0x68] sm:$0x1] }
  0x8e   : > { %v2146_v2 = vrot.slane %v2145_v55, 4  ;;  %v2189_v35 = vrot.slane %v2187_v4, 4  ;;  %v4456_v59 = vrot.slane %v2196_v23, 5  ;;  %v4458_v57 = vrot.slane %v1334_v11, 5 }
  0x8f   : > { %3311 = vmatmul.mubr.msk.bf16.gmra.mrb[12].mxu0 %vm439_vm3, %v3579_v18  ;;  %v2178_v18 = vrot.slane %v2176_v6, 4  ;;  %v2169_v6 = vor.u32 %v2168_v40, %v2165_v44  ;;  %v1340_v53 = vrot.slane %v1338_v48, 4  ;;  %v2127_v52 = vsel %vm3845_vm4, %v2122_v50, %v4395_v15 }
  0x90   : > { %3316 = vmatprep.mubr.msk.bf16.mxu0 %vm439_vm3, %v3049_v54  ;;  %v2200_v54 = vshrl.u32 %v4426_v60, 16  ;;  %v2192_v60 = vrot.slane %v2190_v58, 5  ;;  %v2137_v39 = vsel %vm3845_vm4, %v2132_v29, %v2136_v1  ;;  %v2220_v38 = vshll.u32 %v4454_v12, 16  ;;  %v3580_v1 = vld [vmem:[%s3806_s6 + $0xc] sm:$0xff]  }
  0x91   : > { %3231 = vmatmul.mubr.msk.bf16.gmra.mrb[4].mxu1 %vm439_vm3, %v4767_v22  ;;  %v2179_v22 = vor.u32 %v2178_v18, %v4438_v25  ;;  %v2224_v44 = vshrl.u32 %v4454_v12, 16  ;;  %v4769_v11 = vcombine.low %v4265_v47, %v4283_v51  ;;  %v2151_v15 = vsel %vm3845_vm4, %v2146_v2, %v4404_v49 }
  0x92   : > { %3234 = vmatprep.mubr.msk.bf16.mxu1 %vm439_vm3, %v4768_v33  ;;  %v3045_v33 = vld [vmem:[%s3806_s6 + $0x6c] sm:$0xf]  ;;  %v2202_v20 = vrot.slane %v2200_v54, 4  ;;  %v2161_v41 = vsel %vm3845_vm4, %v2156_v61, %v2160_v9  ;;  %v2170_v40 = vrot.slane %v2169_v6, 4  ;;  %v2184_v18 = vrot.slane %v2182_v7, 5 }
  0x93   : > { %v2211_v26 = vshrl.u32 %v3045_v33, 16  ;;  %v2214_v55 = vshll.u32 %v3045_v33, 16  ;;  %v4770_v4 = vcombine.low %v4304_v62, %v4316_v24  ;;  %v2180_v47 = vrot.slane %v2179_v22, 4  ;;  %v2930_v22 = vld [vmem:[%s3806_s6 + $0x48] sm:$0xf] }
  0x94   : > { %v2193_v51 = vor.u32 %v2192_v60, %v2189_v35  ;;  %v2206_v49 = vshll.u32 %v4466_v28, 16  ;;  %v1341_v58 = vor.u32 %v1340_v53, %v4458_v57  ;;  %v1344_v23 = vshll.u32 %v4124_v0, 16  ;;  %v4495_v60 = vld [vmem:[%s3806_s6 + $0x74] sm:$0x1] }
  0x95   : > { %v3052_v54 = vcombine.low %v2127_v52, %v2137_v39  ;;  %v2213_v48 = vrot.slane %v2211_v26, 4  ;;  %v2216_v62 = vrot.slane %v2214_v55, 5  ;;  %v4489_v24 = vrot.slane %v2220_v38, 5 }
  0x96   : > { %v2226_v50 = vrot.slane %v2224_v44, 4  ;;  %v3053_v29 = vcombine.low %v2151_v15, %v2161_v41  ;;  %v2175_v35 = vsel %vm3845_vm4, %v2170_v40, %v4438_v25  ;;  %v2194_v0 = vrot.slane %v2193_v51, 4  ;;  %v3582_v51 = vld [vmem:[%s3806_s6 + $0x24] sm:$0xff]  }
  0x97   : > { %3317 = vmatmul.mubr.msk.bf16.vlgmr.msra.gmra.mrb[0].mxu0 %vm439_vm3, %v3050_v13  ;;  %v2185_v13 = vsel %vm3845_vm4, %v2180_v47, %v2184_v18  ;;  %v2208_v2 = vrot.slane %v2206_v49, 5  ;;  %v1342_v9 = vrot.slane %v1341_v58, 4  ;;  %v1346_v61 = vrot.slane %v1344_v23, 5 }
  0x98   : > { %3333 = vmatpush3.bf16.msra.mxu0 %v2539_v37  ;;  %3320 = vmatprep.mubr.msk.bf16.mxu0 %vm439_vm3, %v3051_v34  ;;  %v2203_v37 = vor.u32 %v2202_v20, %v4456_v59  ;;  %v2434_v6 = vrot.slane %v4253_v31, 5  ;;  %v2217_v7 = vor.u32 %v2216_v62, %v2213_v48  ;;  %v2227_v33 = vor.u32 %v2226_v50, %v4489_v24  ;;  %v3065_v20 = vld [vmem:[%s3806_s6 + $0x18] sm:$0xe]  ;;  %v3067_v62 = vld [vmem:[%s3806_s6 + $0x30] sm:$0xe] }
  0x99   : > { %3235 = vmatmul.mubr.msk.bf16.gmra.mrb[8].mxu1 %vm439_vm3, %v4769_v11  ;;  %v2230_v25 = vshll.u32 %v4495_v60, 16  ;;  %v4771_v53 = vcombine.low %v4334_v19, %v4346_v10  ;;  %v3054_v52 = vcombine.low %v2175_v35, %v2185_v13  ;;  %v2199_v31 = vsel %vm3845_vm4, %v2194_v0, %v4456_v59  ;;  %v3581_v59 = vld [vmem:[%s3806_s6 + $0x18] sm:$0xff]  }
  0x9a   : > { %3238 = vmatprep.mubr.msk.bf16.mxu1 %vm439_vm3, %v4770_v4  ;;  %v2204_v34 = vrot.slane %v2203_v37, 4  ;;  %v1325_v26 = vshrl.u32 %v2930_v22, 16  ;;  %v1328_v55 = vshll.u32 %v2930_v22, 16  ;;  %v3073_v19 = vrot.slane %v3065_v20, 9  ;;  %v2927_v4 = vld [vmem:[%s3806_s6 + $0x3c] sm:$0xf] }
  0x9b   : > { %v2436_v10 = vrot.slane %v2434_v6, 4  ;;  %v2437_v38 = vrot.slane %v4287_v30, 5  ;;  %v1347_v44 = vsel %vm3845_vm4, %v1342_v9, %v1346_v61  ;;  %v2218_v11 = vrot.slane %v2217_v7, 4  ;;  %v3066_v30 = vld [vmem:[%s3806_s6 + $0x24] sm:$0xe]  ;;  %v3583_v22 = vld [vmem:[%s3806_s6 + $0x30] sm:$0xff]  }
  0x9c   : > { %v2209_v39 = vsel %vm3845_vm4, %v2204_v34, %v2208_v2  ;;  %v2228_v15 = vrot.slane %v2227_v33, 4  ;;  %v2232_v41 = vrot.slane %v2230_v25, 5  ;;  %v1327_v40 = vrot.slane %v1325_v26, 4  ;;  %v3584_v20 = vld [vmem:[%s3806_s6 + $0x3c] sm:$0xff]   ;;  %v2933_v26 = vld [vmem:[%s3806_s6 + $0x54] sm:$0xf] }
  0x9d   : > { %v3055_v18 = vcombine.low %v2199_v31, %v2209_v39  ;;  %v1330_v47 = vrot.slane %v1328_v55, 5  ;;  %v2435_v37 = vsel %vm4000_vm7, %v3073_v19, %v2434_v6  ;;  %v2438_v49 = vsel %vm4000_vm7, %v2436_v10, %v2437_v38  ;;  %v3069_v38 = vld [vmem:[%s3806_s6 + $0x48] sm:$0xe] }
  0x9e   : > { %v2441_v58 = vrot.slane %v4300_v14, 5  ;;  %v2233_v48 = vsel %vm3845_vm4, %v2228_v15, %v2232_v41  ;;  %v2448_v50 = vrot.slane %v4319_v8, 5  ;;  %v1304_v35 = vshll.u32 %v2927_v4, 16 }
  0x9f   : > { %3321 = vmatmul.mubr.msk.bf16.gmra.mrb[4].mxu0 %vm439_vm3, %v3052_v54  ;;  %v1331_v23 = vor.u32 %v1330_v47, %v1327_v40  ;;  %v2223_v54 = vsel %vm3845_vm4, %v2218_v11, %v4489_v24  ;;  %v1310_v14 = vshll.u32 %v4103_v42, 16  ;;  %v3074_v24 = vrot.slane %v3066_v30, 9 }
  0xa0   : > { %3324 = vmatprep.mubr.msk.bf16.mxu0 %vm439_vm3, %v3053_v29  ;;  %v1301_v29 = vshrl.u32 %v2927_v4, 16  ;;  %v2444_v8 = vrot.slane %v4342_v36, 5  ;;  %v3082_v0 = vcombine.low %v2435_v37, %v2438_v49  ;;  %v2443_v34 = vrot.slane %v2441_v58, 4  ;;  %v3585_v37 = vld [vmem:[%s3806_s6 + $0x48] sm:$0xff]  }
  0xa1   : > { %3239 = vmatmul.mubr.msk.bf16.gmra.mrb[12].mxu1 %vm439_vm3, %v4771_v53  ;;  %v1332_v13 = vrot.slane %v1331_v23, 4  ;;  %v3075_v2 = vrot.slane %v3067_v62, 9  ;;  %v3056_v61 = vcombine.low %v2223_v54, %v2233_v48  ;;  %v2450_v6 = vrot.slane %v2448_v50, 4  ;;  %v3586_v23 = vld [vmem:[%s3806_s6 + $0x54] sm:$0xff]  }
  0xa2   : > { %3244 = vmatprep.mubr.msk.bf16.mxu1 %vm439_vm3, %v3580_v1  ;;  %v1314_v1 = vshrl.u32 %v4103_v42, 16  ;;  %v2451_v42 = vrot.slane %v4349_v21, 5  ;;  %v1303_v7 = vrot.slane %v1301_v29, 4  ;;  %v1306_v33 = vrot.slane %v1304_v35, 5 }
  0xa3   : > { %v1337_v9 = vsel %vm3845_vm4, %v1332_v13, %v4458_v57  ;;  %v4551_v25 = vrot.slane %v1310_v14, 5  ;;  %v2442_v53 = vsel %vm4000_vm7, %v3074_v24, %v2441_v58  ;;  %v2445_v57 = vsel %vm4000_vm7, %v2443_v34, %v2444_v8  ;;  %v3070_v24 = vld [vmem:[%s3806_s6 + $0x54] sm:$0xe]  ;;  %v4772_v8 = vld [vmem:[#allocation8_spill] sm:$0xff] }
  0xa4   : > { %v1316_v36 = vrot.slane %v1314_v1, 4  ;;  %v2449_v21 = vsel %vm4000_vm7, %v3075_v2, %v2448_v50  ;;  %v2455_v31 = vrot.slane %v4360_v43, 5  ;;  %v1320_v39 = vshll.u32 %v4106_v45, 16  ;;  %v2936_v50 = vld [vmem:[%s3806_s6 + $0x60] sm:$0xf] }
  0xa5   : > { %v2452_v55 = vsel %vm4000_vm7, %v2450_v6, %v2451_v42  ;;  %v1307_v19 = vor.u32 %v1306_v33, %v1303_v7  ;;  %v3083_v43 = vcombine.low %v2442_v53, %v2445_v57  ;;  %v2458_v11 = vrot.slane %v4402_v46, 5  ;;  %v4774_v33 = vld [vmem:[#allocation5_spill] sm:$0xff] }
  0xa6   : > { %v1317_v10 = vor.u32 %v1316_v36, %v4551_v25  ;;  %v1349_v15 = vshrl.u32 %v2933_v26, 16  ;;  %v1352_v41 = vshll.u32 %v2933_v26, 16  ;;  %v1358_v40 = vshll.u32 %v4132_v17, 16 }
  0xa7   : > { %3325 = vmatmul.mubr.msk.bf16.gmra.mrb[8].mxu0 %vm439_vm3, %v3054_v52  ;;  %v3068_v52 = vld [vmem:[%s3806_s6 + $0x3c] sm:$0xe]  ;;  %v2457_v4 = vrot.slane %v2455_v31, 4  ;;  %v1322_v47 = vrot.slane %v1320_v39, 5  ;;  %v2465_v58 = vrot.slane %v4407_v63, 5  ;;  %v2469_v63 = vrot.slane %v4392_v27, 5 }
  0xa8   : > { %3328 = vmatprep.mubr.msk.bf16.mxu0 %vm439_vm3, %v3055_v18  ;;  %v3076_v45 = vrot.slane %v3068_v52, 9  ;;  %v3084_v18 = vcombine.low %v2449_v21, %v2452_v55  ;;  %v1318_v49 = vrot.slane %v1317_v10, 4  ;;  %v1351_v46 = vrot.slane %v1349_v15, 4  ;;  %v3071_v27 = vld [vmem:[%s3806_s6 + $0x60] sm:$0xe] }
  0xa9   : > { %3245 = vmatmul.mubr.msk.bf16.vlgmr.msra.gmra.mrb[0].mxu1 %vm439_vm3, %v3581_v59  ;;  %v1362_v59 = vshrl.u32 %v4132_v17, 16  ;;  %v1354_v54 = vrot.slane %v1352_v41, 5  ;;  %v1360_v48 = vrot.slane %v1358_v40, 5  ;;  %v2459_v29 = vsel %vm4000_vm7, %v2457_v4, %v2458_v11  ;;  %v3587_v52 = vld [vmem:[%s3806_s6 + $0x60] sm:$0xff]  }
  0xaa   : > { %3351 = vmatpush3.bf16.msra.mxu1 %v3790_v3  ;;  %3248 = vmatprep.mubr.msk.bf16.mxu1 %vm439_vm3, %v3582_v51  ;;  %v4548_v3 = vcombine.low %v1337_v9, %v1347_v44  ;;  %v2462_v44 = vrot.slane %v4371_v16, 5  ;;  %v3077_v51 = vrot.slane %v3069_v38, 9  ;;  %v1308_v16 = vrot.slane %v1307_v19, 4  ;;  %v4773_v9 = vld [vmem:[#allocation6_spill] sm:$0xff] }
  0xab   : > { %v1364_v62 = vrot.slane %v1362_v59, 4  ;;  %v2456_v17 = vsel %vm4000_vm7, %v3076_v45, %v2455_v31  ;;  %v1323_v1 = vsel %vm3845_vm4, %v1318_v49, %v1322_v47  ;;  %v1373_v34 = vshrl.u32 %v2936_v50, 16  ;;  %v3072_v47 = vld [vmem:[%s3806_s6 + $0x6c] sm:$0xe]  ;;  %s3595_s6 = scalar_lea.vmem %s3594_s30, 4096 }
  0xac   : > { %v2464_v30 = vrot.slane %v2462_v44, 4  ;;  %v2463_v35 = vsel %vm4000_vm7, %v3077_v51, %v2462_v44  ;;  %v1313_v14 = vsel %vm3845_vm4, %v1308_v16, %v4551_v25  ;;  %v1376_v2 = vshll.u32 %v2936_v50, 16  ;;  %p3597_p3 = scmp.lt.s32.totalorder %s3595_s6, %s3589_s28 }
  0xad   : > { %v1386_v6 = vshrl.u32 %v4773_v9, 16  ;;  %v3085_v42 = vcombine.low %v2456_v17, %v2459_v29  ;;  %v1365_v7 = vor.u32 %v1364_v62, %v1360_v48  ;;  %v1368_v25 = vshll.u32 %v4774_v33, 16 }
  0xae   : > { %v2466_v13 = vsel %vm4000_vm7, %v2464_v30, %v2465_v58  ;;  %v2471_v53 = vrot.slane %v2469_v63, 4  ;;  %v2472_v57 = vrot.slane %v4445_v56, 5  ;;  %v2944_v21 = vcombine.low %v1313_v14, %v1323_v1  ;;  %p3598_p4 = por %p3597_p3, %p3596_p2 }
  0xaf   : > { %3329 = vmatmul.mubr.msk.bf16.gmra.mrb[12].mxu0 %vm439_vm3, %v3056_v61  ;;  %v1382_v61 = vshll.u32 %v4773_v9, 16  ;;  %v3086_v36 = vcombine.low %v2463_v35, %v2466_v13  ;;  %v3079_v31 = vrot.slane %v3071_v27, 9  ;;  %v2479_v26 = vrot.slane %v4466_v28, 5 }
  0xb0   : > { %3334 = vmatprep.mubr.msk.bf16.mxu0 %vm439_vm3, %v3082_v0  ;;  %v2476_v0 = vrot.slane %v4772_v8, 5  ;;  %v1375_v55 = vrot.slane %v1373_v34, 4  ;;  %v1378_v19 = vrot.slane %v1376_v2, 5  ;;  %v1388_v38 = vrot.slane %v1386_v6, 4  ;;  %p3599_p6 = pnand %p3598_p4, %p3592_p1 }
  0xb1   : > { %3249 = vmatmul.mubr.msk.bf16.gmra.mrb[4].mxu1 %vm439_vm3, %v3583_v22  ;;  %v1355_v22 = vor.u32 %v1354_v54, %v1351_v46  ;;  %v1384_v10 = vrot.slane %v1382_v61, 5  ;;  %v1370_v45 = vrot.slane %v1368_v25, 5  ;;  %v2473_v28 = vsel %vm4000_vm7, %v2471_v53, %v2472_v57 }
  0xb2   : > { %3252 = vmatprep.mubr.msk.bf16.mxu1 %vm439_vm3, %v3584_v20  ;;  %v3078_v20 = vrot.slane %v3070_v24, 9  ;;  %v2478_v39 = vrot.slane %v2476_v0, 4  ;;  %v2477_v11 = vsel %vm4000_vm7, %v3079_v31, %v2476_v0  ;;  %v2483_v15 = vrot.slane %v4454_v12, 5 }
  0xb3   : > { %v1356_v44 = vrot.slane %v1355_v22, 4  ;;  %v1379_v40 = vor.u32 %v1378_v19, %v1375_v55  ;;  %v1389_v59 = vor.u32 %v1388_v38, %v1384_v10  ;;  %v3080_v30 = vrot.slane %v3072_v47, 9 }
  0xb4   : > { %v2470_v56 = vsel %vm4000_vm7, %v3078_v20, %v2469_v63  ;;  %v2480_v41 = vsel %vm4000_vm7, %v2478_v39, %v2479_v26  ;;  %v2485_v12 = vrot.slane %v2483_v15, 4  ;;  %v2486_v58 = vrot.slane %v4495_v60, 5 }
  0xb5   : > { %v1361_v51 = vsel %vm3845_vm4, %v1356_v44, %v1360_v48  ;;  %v3087_v16 = vcombine.low %v2470_v56, %v2473_v28  ;;  %v3088_v49 = vcombine.low %v2477_v11, %v2480_v41  ;;  %v1380_v46 = vrot.slane %v1379_v40, 4 }
  0xb6   : > { %v1390_v54 = vrot.slane %v1389_v59, 4  ;;  %v2484_v48 = vsel %vm4000_vm7, %v3080_v30, %v2483_v15  ;;  %v2487_v50 = vsel %vm4000_vm7, %v2485_v12, %v2486_v58 }
  0xb7   : > { %3335 = vmatmul.mubr.msk.bf16.vlgmr.msra.gmra.mrb[0].mxu0 %vm439_vm3, %v3083_v43  ;;  %v1366_v43 = vrot.slane %v1365_v7, 4  ;;  %v1385_v60 = vsel %vm3845_vm4, %v1380_v46, %v1384_v10  ;;  %v3089_v29 = vcombine.low %v2484_v48, %v2487_v50 }
  0xb8   : > { %3338 = vmatprep.mubr.msk.bf16.mxu0 %vm439_vm3, %v3084_v18  ;;  %v4775_v18 = vld [vmem:[#allocation7_spill] sm:$0xff] }
  0xb9   : > { %3253 = vmatmul.mubr.msk.bf16.gmra.mrb[8].mxu1 %vm439_vm3, %v3585_v37  ;;  %v1392_v4 = vshll.u32 %v4775_v18, 16  ;;  %v1371_v37 = vsel %vm3845_vm4, %v1366_v43, %v1370_v45 }
  0xba   : > { %3256 = vmatprep.mubr.msk.bf16.mxu1 %vm439_vm3, %v3586_v23  ;;  %v2946_v23 = vcombine.low %v1361_v51, %v1371_v37 }
  0xbb   : > { %v1394_v62 = vrot.slane %v1392_v4, 5 }
  0xbd   : > { %v1395_v17 = vsel %vm3845_vm4, %v1390_v54, %v1394_v62 }
  0xbf   : > { %3339 = vmatmul.mubr.msk.bf16.gmra.mrb[4].mxu0 %vm439_vm3, %v3085_v42 }
  0xc0   : > { %3342 = vmatprep.mubr.msk.bf16.mxu0 %vm439_vm3, %v3086_v36 }
  0xc1   : > { %3257 = vmatmul.mubr.msk.bf16.gmra.mrb[12].mxu1 %vm439_vm3, %v3587_v52 }
  0xc2   : > { %3270 = vmatprep.mubr.msk.bf16.mxu1 %vm439_vm3, %v2944_v21 }
  0xc7   : > { %3343 = vmatmul.mubr.msk.bf16.gmra.mrb[8].mxu0 %vm439_vm3, %v3087_v16 }
  0xc8   : > { %3346 = vmatprep.mubr.msk.bf16.mxu0 %vm439_vm3, %v3088_v49 }
  0xc9   : > { %3271 = vmatmul.mubr.msk.bf16.vlgmr.msra.gmra.mrb[8].mxu1 %vm439_vm3, %v4548_v3  ;;  %v2947_v3 = vcombine.low %v1385_v60, %v1395_v17 }
  0xca   : > { %3274 = vmatprep.mubr.msk.bf16.mxu1 %vm439_vm3, %v2946_v23 }
  0xcf   : > { %3347 = vmatmul.mubr.msk.bf16.gmra.mrb[12].mxu0 %vm439_vm3, %v3089_v29 }
  0xd1   : > { %3275 = vmatmul.mubr.msk.bf16.gmra.mrb[12].mxu1 %vm439_vm3, %v2947_v3 }
 0x17c   : > { %v3246_v35 = vpop.f32.mrb[0].mxu1 }
 0x17d   : > { %v1101_v63 = vpop.f32.mrb[1].mxu1 }
 0x17e   : > { %v3247_v5 = vpop.f32.mrb[2].mxu1 }
 0x17f   : > { %v1104_v14 = vpop.f32.mrb[3].mxu1 }
 0x184   : > { %v3250_v1 = vpop.f32.mrb[4].mxu1 }
 0x185   : > { %v1117_v13 = vpop.f32.mrb[5].mxu1 }
 0x186   : > { %v3251_v24 = vpop.f32.mrb[6].mxu1 }
 0x187   : > { %v1120_v8 = vpop.f32.mrb[7].mxu1 }
 0x18a   : > { %v3336_v0 = vpop.f32.mrb[0].mxu0 }
 0x18b   : > { %v3352_v27 = vadd.f32 %v3336_v0, %v3246_v35  ;;  %v2575_v34 = vpop.f32.mrb[1].mxu0 }
 0x18c   : > { %v3353_v2 = vadd.f32 %v2575_v34, %v1101_v63  ;;  %v3337_v9 = vpop.f32.mrb[2].mxu0 }
 0x18d   : > { %v2663_v61 = vadd.f32 %v3352_v27, %v4646_v32  ;;  %v3354_v6 = vadd.f32 %v3337_v9, %v3247_v5  ;;  %v2578_v42 = vpop.f32.mrb[3].mxu0 }
 0x18e   : > { %v2661_v22 = vadd.f32 %v3353_v2, %v4646_v32  ;;  %v3355_v7 = vadd.f32 %v2578_v42, %v1104_v14 }
 0x18f   : > { %v2679_v33 = vmax.f32 %v2663_v61, 0.0  ;;  %v2664_v25 = vadd.f32 %v3354_v6, %v4646_v32 }
 0x190   : > { %v2677_v36 = vmax.f32 %v2661_v22, 0.0  ;;  %v2662_v20 = vadd.f32 %v3355_v7, %v4646_v32 }
 0x191   : > { %2695 = vst [vmem:[%s4654_s9 + $0x10] sm:$0xff] %v2679_v33  ;;  %v2680_v53 = vmax.f32 %v2664_v25, 0.0 }
 0x192   : > { %2693 = vst [vmem:[%s4654_s9] sm:$0xff] %v2677_v36  ;;  %v2678_v57 = vmax.f32 %v2662_v20, 0.0  ;;  %v3340_v52 = vpop.f32.mrb[4].mxu0 }
 0x193   : > { %2696 = vst [vmem:[%s4654_s9 + $0x18] sm:$0xff] %v2680_v53  ;;  %v3356_v21 = vadd.f32 %v3340_v52, %v3250_v1  ;;  %v2591_v31 = vpop.f32.mrb[5].mxu0 }
 0x194   : > { %2694 = vst [vmem:[%s4654_s9 + $0x8] sm:$0xff] %v2678_v57  ;;  %v3357_v39 = vadd.f32 %v2591_v31, %v1117_v13  ;;  %v3341_v26 = vpop.f32.mrb[6].mxu0 }
 0x195   : > { %v2667_v55 = vadd.f32 %v3356_v21, %v4646_v32  ;;  %v3358_v19 = vadd.f32 %v3341_v26, %v3251_v24  ;;  %v2594_v10 = vpop.f32.mrb[7].mxu0 }
 0x196   : > { %v2665_v38 = vadd.f32 %v3357_v39, %v4646_v32  ;;  %v3359_v44 = vadd.f32 %v2594_v10, %v1120_v8 }
 0x197   : > { %v2683_v43 = vmax.f32 %v2667_v55, 0.0  ;;  %v2668_v45 = vadd.f32 %v3358_v19, %v4646_v32 }
 0x198   : > { %v2681_v56 = vmax.f32 %v2665_v38, 0.0  ;;  %v2666_v28 = vadd.f32 %v3359_v44, %v4646_v32 }
 0x199   : > { %2699 = vst [vmem:[%s4654_s9 + $0x30] sm:$0xff] %v2683_v43  ;;  %v2684_v11 = vmax.f32 %v2668_v45, 0.0 }
 0x19a   : > { %2697 = vst [vmem:[%s4654_s9 + $0x20] sm:$0xff] %v2681_v56  ;;  %v2682_v15 = vmax.f32 %v2666_v28, 0.0  ;;  %v3344_v41 = vpop.f32.mrb[8].mxu0 }
 0x19b   : > { %2700 = vst [vmem:[%s4654_s9 + $0x38] sm:$0xff] %v2684_v11  ;;  %v2607_v59 = vpop.f32.mrb[9].mxu0 }
 0x19c   : > { %v3272_v40 = vpop.f32.mrb[8].mxu1  ;;  %2698 = vst [vmem:[%s4654_s9 + $0x28] sm:$0xff] %v2682_v15  ;;  %v3345_v47 = vpop.f32.mrb[10].mxu0 }
 0x19d   : > { %v3360_v18 = vadd.f32 %v3344_v41, %v3272_v40  ;;  %v1515_v4 = vpop.f32.mrb[9].mxu1  ;;  %v2610_v16 = vpop.f32.mrb[11].mxu0 }
 0x19e   : > { %v3361_v51 = vadd.f32 %v2607_v59, %v1515_v4  ;;  %v3273_v37 = vpop.f32.mrb[10].mxu1 }
 0x19f   : > { %v2671_v49 = vadd.f32 %v3360_v18, %v4646_v32  ;;  %v3362_v30 = vadd.f32 %v3345_v47, %v3273_v37  ;;  %v1518_v12 = vpop.f32.mrb[11].mxu1 }
 0x1a0   : > { %v2669_v58 = vadd.f32 %v3361_v51, %v4646_v32  ;;  %v3363_v23 = vadd.f32 %v2610_v16, %v1518_v12 }
 0x1a1   : > { %v2687_v46 = vmax.f32 %v2671_v49, 0.0  ;;  %v2672_v54 = vadd.f32 %v3362_v30, %v4646_v32 }
 0x1a2   : > { %v2685_v62 = vmax.f32 %v2669_v58, 0.0  ;;  %v2670_v48 = vadd.f32 %v3363_v23, %v4646_v32  ;;  %v3348_v60 = vpop.f32.mrb[12].mxu0 }
 0x1a3   : > { %2703 = vst [vmem:[%s4654_s9 + $0x50] sm:$0xff] %v2687_v46  ;;  %v2688_v50 = vmax.f32 %v2672_v54, 0.0  ;;  %v2623_v3 = vpop.f32.mrb[13].mxu0 }
 0x1a4   : > { %2701 = vst [vmem:[%s4654_s9 + $0x40] sm:$0xff] %v2685_v62  ;;  %v2686_v17 = vmax.f32 %v2670_v48, 0.0  ;;  %v3276_v29 = vpop.f32.mrb[12].mxu1  ;;  %v3349_v5 = vpop.f32.mrb[14].mxu0 }
 0x1a5   : > { %2704 = vst [vmem:[%s4654_s9 + $0x58] sm:$0xff] %v2688_v50  ;;  %v3364_v35 = vadd.f32 %v3348_v60, %v3276_v29  ;;  %v1531_v63 = vpop.f32.mrb[13].mxu1  ;;  %v2626_v13 = vpop.f32.mrb[15].mxu0 }
 0x1a6   : > { %2702 = vst [vmem:[%s4654_s9 + $0x48] sm:$0xff] %v2686_v17  ;;  %v3365_v14 = vadd.f32 %v2623_v3, %v1531_v63  ;;  %v3277_v1 = vpop.f32.mrb[14].mxu1 }
 0x1a7   : > { %v2675_v24 = vadd.f32 %v3364_v35, %v4646_v32  ;;  %v3366_v8 = vadd.f32 %v3349_v5, %v3277_v1  ;;  %v1534_v0 = vpop.f32.mrb[15].mxu1 }
 0x1a8   : > { %v2673_v27 = vadd.f32 %v3365_v14, %v4646_v32  ;;  %v3367_v34 = vadd.f32 %v2626_v13, %v1534_v0 }
 0x1a9   : > { %v2691_v2 = vmax.f32 %v2675_v24, 0.0  ;;  %v2676_v9 = vadd.f32 %v3366_v8, %v4646_v32 }
 0x1aa   : > { %v2689_v61 = vmax.f32 %v2673_v27, 0.0  ;;  %v2674_v6 = vadd.f32 %v3367_v34, %v4646_v32 }
 0x1ab   : > { %2707 = vst [vmem:[%s4654_s9 + $0x70] sm:$0xff] %v2691_v2  ;;  %v2692_v42 = vmax.f32 %v2676_v9, 0.0 }
 0x1ac   : > { %2705 = vst [vmem:[%s4654_s9 + $0x60] sm:$0xff] %v2689_v61  ;;  %v2690_v22 = vmax.f32 %v2674_v6, 0.0 }
 0x1ad   : > { %2708 = vst [vmem:[%s4654_s9 + $0x78] sm:$0xff] %v2692_v42 }
 0x1ae   : > { %2706 = vst [vmem:[%s4654_s9 + $0x68] sm:$0xff] %v2690_v22 }
 0x1af   : > { %3602 = shalt.err (!%p3599_p6)
}
 0x1b0   : > { %s3603_s4 = scalar_lea.hbm %s4687_s24, 2048  ;;  %s3607_s9 = scalar_lea.hbm %s4751_s3, 8192 }
 0x1b1   : > { %p3604_p8 = scmp.ne.s32.totalorder %s4687_s24, %s3603_s4  ;;  %p3608_p11 = scmp.lt.u32.totalorder %s4687_s24, %s4751_s3 }
 0x1b2   : > { %p3609_p12 = scmp.lt.u32.totalorder %s3607_s9, %s3603_s4  ;;  %p3611_p0 = scmp.lt.u32.totalorder %s3603_s4, %s4687_s24 }
 0x1b3   : > { %p3605_p9 = pnand %p3604_p8, %p3761_p5 }
 0x1b4   : > { %p3610_p13 = por %p3609_p12, %p3608_p11 }
 0x1b5   : > { %p3606_p10 = pneg %p3605_p9 }
 0x1b6   : > { %p3612_p1 = por %p3611_p0, %p3610_p13 }
 0x1b8   : > { %p3613_p2 = pnand %p3612_p1, %p3606_p10 }
 0x1ba   : > { %3616 = shalt.err (!%p3613_p2)
}
 0x1bb   : > { %s3686_s16 = smov 128   ;;  %s3687_s15 = smov 8  }
 0x1bc   : > { %3491 = dma.vmem_to_hbm [thread:$0]  (%p3761_p5), %s4689_s20, 2048, %s4687_s24, %s4696_s25, %s3686_s16, %s3686_s16, %s3687_s15  }
 0x1bd PF: > { %p3497_p3 = scmp.ge.s32.totalorder %s3683_s19, 2  ;;  %s2740_s23 = sand.u32 1, %s3655_s12  }
 0x1be   : > { %s2741_s28 = scalar_lea.sflag [#allocation3], %s2740_s23 }
 0x1bf   : > { %p3494_p4 = pnand %p3497_p3, %p3767_p7 }
 0x1c1   : > { %3650 = dma.done.wait (!%p3494_p4), %s2741_s28, 2048  }
 0x1c2   : > { %3652 = vsyncadd (!%p3494_p4), %s2741_s28, 4294965248  ;;  %s16_s19 = sadd.s32 1, %s3683_s19   ;;  %s4776_s12 = smov %s3659_s13 }
 0x1c3   : > { %p13_p6 = scmp.ge.s32.totalorder %s16_s19, 6   ;;  %s4777_s13 = smov %s3663_s14 }
 0x1c4   : > { %s4778_s14 = smov %s3777_s5  ;;  %s4779_s15 = smov %s3675_s17 }
 0x1c5   : > { %s4780_s16 = smov %s3679_s18  ;;  %s4781_s17 = smov %s4784_s21 }
 0x1c6   : > { %s4782_s18 = smov %s4788_s22  ;;  %15 = sbr.rel (!%p13_p6) target bundleno = 5 (0x5), region = 78 }
 0x1cd   :  { %2746 = vsyncpa [#allocation3], 1 }
 0x1ce   :  { %2748 = vsyncpa [#allocation3 + $0x1], 1 }

</bundles_post_ra>
